<compile_context>
chip_gen: v7x
topology: tpu7x:2x2x1
jax: 0.10.0
libtpu: 0.0.40
codegen_flags: <defaults>
</compile_context>

<pallas_src>
import functools

import jax
import jax.numpy as jnp
from jax.experimental import pallas as pl
from jax.experimental.pallas import tpu as pltpu


# ----------------------------------------------------------------------------
# Pallas kernel: full 2-layer LSTM recurrence + mu / softplus(sigma) head.
# Gate order inside the kernel (pre-permuted by the wrapper): [i, f, o, g].
# ----------------------------------------------------------------------------
def deepar_kernel(x_ref,                        # (T*B, D_in) bf16, time-major rows t*B+b
                  wih0_ref, b0_ref,             # (D_in, 4H) bf16, (1, 4H) f32
                  whh0_ref,                     # (H, 4H)    bf16
                  wih1_ref, whh1_ref, b1_ref,   # (H, 4H) bf16, (H, 4H) bf16, (1, 4H) f32
                  whead_ref, bhead_ref,         # (H, 2) f32 [mu | sigma], (1, 2) f32
                  out_ref,                      # (B, 2) f32: [mu, softplus(sigma)]
                  *, T, B, H):
    f32 = jnp.float32
    bf16 = jnp.bfloat16

    def gates_to_hc(gates, c):
        # gates layout: [i | f | o | g] -> one sigmoid pass over the 3H slab.
        ifo = jax.nn.sigmoid(gates[:, :3 * H])
        g = jnp.tanh(gates[:, 3 * H:4 * H])
        i = ifo[:, 0 * H:1 * H]
        f = ifo[:, 1 * H:2 * H]
        o = ifo[:, 2 * H:3 * H]
        c_new = f * c + i * g
        h_new = o * jnp.tanh(c_new)
        return h_new, c_new

    zeros = jnp.zeros((B, H), f32)

    # ---- layer 0: input projection for ALL timesteps in one MXU matmul ----
    xw0 = jnp.dot(x_ref[...], wih0_ref[...],
                  preferred_element_type=f32) + b0_ref[...]          # (T*B, 4H) f32
    whh0 = whh0_ref[...]                                             # (H, 4H) bf16

    h0, c0 = zeros, zeros
    h0_steps = []
    for t in range(T):                                               # static unroll
        g0 = xw0[t * B:(t + 1) * B, :] + jnp.dot(
            h0.astype(bf16), whh0, preferred_element_type=f32)       # (B, 4H)
        h0, c0 = gates_to_hc(g0, c0)
        h0_steps.append(h0)

    # ---- layer 1: input projection also hoisted into one MXU matmul ----
    h0_all = jnp.concatenate(h0_steps, axis=0).astype(bf16)          # (T*B, H)
    xw1 = jnp.dot(h0_all, wih1_ref[...],
                  preferred_element_type=f32) + b1_ref[...]          # (T*B, 4H) f32
    whh1 = whh1_ref[...]                                             # (H, 4H) bf16

    h1, c1 = zeros, zeros
    for t in range(T):                                               # static unroll
        g1 = xw1[t * B:(t + 1) * B, :] + jnp.dot(
            h1.astype(bf16), whh1, preferred_element_type=f32)       # (B, 4H)
        h1, c1 = gates_to_hc(g1, c1)

    # ---- mu / sigma head on the last hidden state (f32, one-time cost) ----
    head = jnp.dot(h1, whead_ref[...],
                   preferred_element_type=f32) + bhead_ref[...]      # (B, 2)
    out_ref[...] = jnp.concatenate(
        [head[:, 0:1], jax.nn.softplus(head[:, 1:2])], axis=1)


# ----------------------------------------------------------------------------
# Wrapper: layout plumbing (time-major x, bf16 weights, gate-column permute).
# ----------------------------------------------------------------------------
def _gate_reorder(w, H):
    """PyTorch nn.LSTM gate order [i, f, g, o] -> kernel order [i, f, o, g]."""
    return jnp.concatenate(
        [w[..., 0:2 * H], w[..., 3 * H:4 * H], w[..., 2 * H:3 * H]], axis=-1)


def deepar_forward(feature_g1, params):
    """feature_g1: (bs, T, K, d) -> {"mu": (bs, 1), "sigma": (bs, 1)}"""
    bs, T, K, d = feature_g1.shape
    D_in = K * d
    H = params["whh0"].shape[0]

    x = feature_g1.astype(jnp.float32).reshape(bs, T, D_in)
    # time-major, flattened: row t*B + b ; bf16 MXU operand (layout plumbing)
    x2d = jnp.transpose(x, (1, 0, 2)).reshape(T * bs, D_in).astype(jnp.bfloat16)

    ro = functools.partial(_gate_reorder, H=H)
    vmem = pl.BlockSpec(memory_space=pltpu.MemorySpace.VMEM)
    kernel = functools.partial(deepar_kernel, T=T, B=bs, H=H)

    out = pl.pallas_call(
        kernel,
        out_shape=jax.ShapeDtypeStruct((bs, 2), jnp.float32),
        in_specs=[vmem] * 9,
        out_specs=vmem,
    )(x2d,
      ro(params["wih0"]).astype(jnp.bfloat16), ro(params["b0"]),
      ro(params["whh0"]).astype(jnp.bfloat16),
      ro(params["wih1"]).astype(jnp.bfloat16),
      ro(params["whh1"]).astype(jnp.bfloat16), ro(params["b1"]),
      params["whead"], params["bhead"])

    return {"mu": out[:, 0:1], "sigma": out[:, 1:2]}


# ----------------------------------------------------------------------------
# Deterministic parameter init (mimics nn.LSTM uniform init + forget-bias=1.0).
# Params are stored in PyTorch gate order [i, f, g, o], transposed to (K, 4H).
# ----------------------------------------------------------------------------
def init_params(key, input_size, hidden_size):
    H = hidden_size
    ks = jax.random.split(key, 12)
    s_h = 1.0 / jnp.sqrt(H)

    def uni(k, shape, s):
        return jax.random.uniform(k, shape, jnp.float32, -s, s)

    # Layer 0
    w_ih0 = uni(ks[0], (4 * H, input_size), s_h)
    w_hh0 = uni(ks[1], (4 * H, H), s_h)
    b_ih0 = uni(ks[2], (4 * H,), s_h).at[H:2 * H].set(1.0)   # forget-gate bias fill
    b_hh0 = uni(ks[3], (4 * H,), s_h).at[H:2 * H].set(1.0)
    # Layer 1
    w_ih1 = uni(ks[4], (4 * H, H), s_h)
    w_hh1 = uni(ks[5], (4 * H, H), s_h)
    b_ih1 = uni(ks[6], (4 * H,), s_h).at[H:2 * H].set(1.0)
    b_hh1 = uni(ks[7], (4 * H,), s_h).at[H:2 * H].set(1.0)
    # Heads: distribution_mu / distribution_sigma (Linear(H, 1) each)
    s_lin = 1.0 / jnp.sqrt(H)
    w_mu = uni(ks[8], (1, H), s_lin)
    b_mu = uni(ks[9], (1,), s_lin)
    w_sg = uni(ks[10], (1, H), s_lin)
    b_sg = uni(ks[11], (1,), s_lin)

    return {
        "wih0": w_ih0.T,                         # (D_in, 4H)
        "whh0": w_hh0.T,                         # (H, 4H)
        "b0": (b_ih0 + b_hh0)[None, :],          # (1, 4H)
        "wih1": w_ih1.T,                         # (H, 4H)
        "whh1": w_hh1.T,                         # (H, 4H)
        "b1": (b_ih1 + b_hh1)[None, :],          # (1, 4H)
        "whead": jnp.concatenate([w_mu, w_sg], axis=0).T,        # (H, 2)
        "bhead": jnp.concatenate([b_mu, b_sg], axis=0)[None, :], # (1, 2)
    }


# ----------------------------------------------------------------------------
# Pure-JAX reference (same math, PyTorch gate order). mxu_dtype=bf16 mirrors
# the kernel's MXU operand casts; mxu_dtype=f32 is full-precision semantics.
# ----------------------------------------------------------------------------
def deepar_ref(feature_g1, params, mxu_dtype=jnp.float32):
    bs, T, K, d = feature_g1.shape
    H = params["whh0"].shape[0]
    x = feature_g1.astype(jnp.float32).reshape(bs, T, K * d)

    def mm(a, b):
        return jnp.dot(a.astype(mxu_dtype), b.astype(mxu_dtype),
                       preferred_element_type=jnp.float32)

    def gates_to_hc(gates, c):
        i = jax.nn.sigmoid(gates[:, 0 * H:1 * H])
        f = jax.nn.sigmoid(gates[:, 1 * H:2 * H])
        g = jnp.tanh(gates[:, 2 * H:3 * H])
        o = jax.nn.sigmoid(gates[:, 3 * H:4 * H])
        c_new = f * c + i * g
        return o * jnp.tanh(c_new), c_new

    h0 = c0 = h1 = c1 = jnp.zeros((bs, H), jnp.float32)
    for t in range(T):
        g0 = mm(x[:, t, :], params["wih0"]) + params["b0"] + mm(h0, params["whh0"])
        h0, c0 = gates_to_hc(g0, c0)
        g1 = mm(h0, params["wih1"]) + params["b1"] + mm(h1, params["whh1"])
        h1, c1 = gates_to_hc(g1, c1)

    head = h1 @ params["whead"] + params["bhead"]
    return {"mu": head[:, 0:1], "sigma": jax.nn.softplus(head[:, 1:2])}


if __name__ == "__main__":
    bs, T, K_g1, d = 2, 8, 4, 4          # input_size = K_g1 * d = 16
    hidden_size = 64

    key = jax.random.PRNGKey(0)
    k_x, k_p = jax.random.split(key)
    feature_g1 = jax.random.normal(k_x, (bs, T, K_g1, d), dtype=jnp.float32)
    params = init_params(k_p, K_g1 * d, hidden_size)

    out = deepar_forward(feature_g1, params)
    mu = jax.block_until_ready(out["mu"])
    sigma = jax.block_until_ready(out["sigma"])
    assert mu.shape == (bs, 1) and sigma.shape == (bs, 1)

    # Tight check against a reference that mirrors the kernel's bf16 MXU numerics.
    ref_bf16 = deepar_ref(feature_g1, params, mxu_dtype=jnp.bfloat16)
    assert jnp.allclose(mu, ref_bf16["mu"], atol=1e-3, rtol=1e-3)
    assert jnp.allclose(sigma, ref_bf16["sigma"], atol=1e-3, rtol=1e-3)

    # Loose check against the full-f32 module semantics (bf16 weight quantization).
    ref_f32 = deepar_ref(feature_g1, params, mxu_dtype=jnp.float32)
    assert jnp.allclose(mu, ref_f32["mu"], atol=5e-2, rtol=5e-2)
    assert jnp.allclose(sigma, ref_f32["sigma"], atol=5e-2, rtol=5e-2)

    print("KERNEL_OK")
</pallas_src>

<mosaic_0001>
module attributes {stable_mosaic.version = 11 : i64} {
  func.func @deepar_kernel(%arg0: memref<16x16xbf16, #tpu.memory_space<vmem>>, %arg1: memref<16x256xbf16, #tpu.memory_space<vmem>>, %arg2: memref<1x256xf32, #tpu.memory_space<vmem>>, %arg3: memref<64x256xbf16, #tpu.memory_space<vmem>>, %arg4: memref<64x256xbf16, #tpu.memory_space<vmem>>, %arg5: memref<64x256xbf16, #tpu.memory_space<vmem>>, %arg6: memref<1x256xf32, #tpu.memory_space<vmem>>, %arg7: memref<64x2xf32, #tpu.memory_space<vmem>>, %arg8: memref<1x2xf32, #tpu.memory_space<vmem>>, %arg9: memref<2x2xf32, #tpu.memory_space<vmem>>) attributes {dimension_semantics = [], scalar_prefetch = 0 : i64, scratch_operands = 0 : i64, tpu.core_type = #tpu.core_type<tc>} {
    %cst = arith.constant 0.000000e+00 : f32
    %0 = vector.broadcast %cst : f32 to vector<2x64xf32>
    %c0 = arith.constant 0 : index
    %c0_0 = arith.constant 0 : index
    %1 = vector.load %arg0[%c0, %c0_0] : memref<16x16xbf16, #tpu.memory_space<vmem>>, vector<16x16xbf16>
    %c0_1 = arith.constant 0 : index
    %c0_2 = arith.constant 0 : index
    %2 = vector.load %arg1[%c0_1, %c0_2] : memref<16x256xbf16, #tpu.memory_space<vmem>>, vector<16x256xbf16>
    %cst_3 = arith.constant dense<0.000000e+00> : vector<16x256xf32>
    %3 = tpu.matmul %1, %2, %cst_3 {dimension_numbers = #tpu.dot_dimension_numbers<[1], [0], [0], [1], [0, 0, 1, 1], [], []>} : vector<16x16xbf16>, vector<16x256xbf16>, vector<16x256xf32> -> vector<16x256xf32>
    %c0_4 = arith.constant 0 : index
    %c0_5 = arith.constant 0 : index
    %4 = vector.load %arg2[%c0_4, %c0_5] : memref<1x256xf32, #tpu.memory_space<vmem>>, vector<1x256xf32>
    %5 = vector.broadcast %4 : vector<1x256xf32> to vector<16x256xf32>
    %6 = arith.addf %3, %5 : vector<16x256xf32>
    %c0_6 = arith.constant 0 : index
    %c0_7 = arith.constant 0 : index
    %7 = vector.load %arg3[%c0_6, %c0_7] : memref<64x256xbf16, #tpu.memory_space<vmem>>, vector<64x256xbf16>
    %8 = vector.extract_strided_slice %6 {offsets = [0, 0], sizes = [2, 256], strides = [1, 1]} : vector<16x256xf32> to vector<2x256xf32>
    %9 = arith.truncf %0 : vector<2x64xf32> to vector<2x64xbf16>
    %cst_8 = arith.constant dense<0.000000e+00> : vector<2x256xf32>
    %10 = tpu.matmul %9, %7, %cst_8 {dimension_numbers = #tpu.dot_dimension_numbers<[1], [0], [0], [1], [0, 0, 1, 1], [], []>} : vector<2x64xbf16>, vector<64x256xbf16>, vector<2x256xf32> -> vector<2x256xf32>
    %11 = arith.addf %8, %10 : vector<2x256xf32>
    %12 = vector.extract_strided_slice %11 {offsets = [0, 0], sizes = [2, 192], strides = [1, 1]} : vector<2x256xf32> to vector<2x192xf32>
    %13 = arith.negf %12 : vector<2x192xf32>
    %14 = math.exp %13 : vector<2x192xf32>
    %cst_9 = arith.constant 1.000000e+00 : f32
    %15 = vector.broadcast %cst_9 : f32 to vector<2x192xf32>
    %16 = arith.addf %15, %14 : vector<2x192xf32>
    %17 = arith.divf %15, %16 : vector<2x192xf32>
    %18 = vector.extract_strided_slice %11 {offsets = [0, 192], sizes = [2, 64], strides = [1, 1]} : vector<2x256xf32> to vector<2x64xf32>
    %19 = math.tanh %18 : vector<2x64xf32>
    %20 = vector.extract_strided_slice %17 {offsets = [0, 0], sizes = [2, 64], strides = [1, 1]} : vector<2x192xf32> to vector<2x64xf32>
    %21 = vector.extract_strided_slice %17 {offsets = [0, 64], sizes = [2, 64], strides = [1, 1]} : vector<2x192xf32> to vector<2x64xf32>
    %22 = vector.extract_strided_slice %17 {offsets = [0, 128], sizes = [2, 64], strides = [1, 1]} : vector<2x192xf32> to vector<2x64xf32>
    %23 = arith.mulf %21, %0 : vector<2x64xf32>
    %24 = arith.mulf %20, %19 : vector<2x64xf32>
    %25 = arith.addf %23, %24 : vector<2x64xf32>
    %26 = math.tanh %25 : vector<2x64xf32>
    %27 = arith.mulf %22, %26 : vector<2x64xf32>
    %28 = vector.extract_strided_slice %6 {offsets = [2, 0], sizes = [2, 256], strides = [1, 1]} : vector<16x256xf32> to vector<2x256xf32>
    %29 = arith.truncf %27 : vector<2x64xf32> to vector<2x64xbf16>
    %cst_10 = arith.constant dense<0.000000e+00> : vector<2x256xf32>
    %30 = tpu.matmul %29, %7, %cst_10 {dimension_numbers = #tpu.dot_dimension_numbers<[1], [0], [0], [1], [0, 0, 1, 1], [], []>} : vector<2x64xbf16>, vector<64x256xbf16>, vector<2x256xf32> -> vector<2x256xf32>
    %31 = arith.addf %28, %30 : vector<2x256xf32>
    %32 = vector.extract_strided_slice %31 {offsets = [0, 0], sizes = [2, 192], strides = [1, 1]} : vector<2x256xf32> to vector<2x192xf32>
    %33 = arith.negf %32 : vector<2x192xf32>
    %34 = math.exp %33 : vector<2x192xf32>
    %cst_11 = arith.constant 1.000000e+00 : f32
    %35 = vector.broadcast %cst_11 : f32 to vector<2x192xf32>
    %36 = arith.addf %35, %34 : vector<2x192xf32>
    %37 = arith.divf %35, %36 : vector<2x192xf32>
    %38 = vector.extract_strided_slice %31 {offsets = [0, 192], sizes = [2, 64], strides = [1, 1]} : vector<2x256xf32> to vector<2x64xf32>
    %39 = math.tanh %38 : vector<2x64xf32>
    %40 = vector.extract_strided_slice %37 {offsets = [0, 0], sizes = [2, 64], strides = [1, 1]} : vector<2x192xf32> to vector<2x64xf32>
    %41 = vector.extract_strided_slice %37 {offsets = [0, 64], sizes = [2, 64], strides = [1, 1]} : vector<2x192xf32> to vector<2x64xf32>
    %42 = vector.extract_strided_slice %37 {offsets = [0, 128], sizes = [2, 64], strides = [1, 1]} : vector<2x192xf32> to vector<2x64xf32>
    %43 = arith.mulf %41, %25 : vector<2x64xf32>
    %44 = arith.mulf %40, %39 : vector<2x64xf32>
    %45 = arith.addf %43, %44 : vector<2x64xf32>
    %46 = math.tanh %45 : vector<2x64xf32>
    %47 = arith.mulf %42, %46 : vector<2x64xf32>
    %48 = vector.extract_strided_slice %6 {offsets = [4, 0], sizes = [2, 256], strides = [1, 1]} : vector<16x256xf32> to vector<2x256xf32>
    %49 = arith.truncf %47 : vector<2x64xf32> to vector<2x64xbf16>
    %cst_12 = arith.constant dense<0.000000e+00> : vector<2x256xf32>
    %50 = tpu.matmul %49, %7, %cst_12 {dimension_numbers = #tpu.dot_dimension_numbers<[1], [0], [0], [1], [0, 0, 1, 1], [], []>} : vector<2x64xbf16>, vector<64x256xbf16>, vector<2x256xf32> -> vector<2x256xf32>
    %51 = arith.addf %48, %50 : vector<2x256xf32>
    %52 = vector.extract_strided_slice %51 {offsets = [0, 0], sizes = [2, 192], strides = [1, 1]} : vector<2x256xf32> to vector<2x192xf32>
    %53 = arith.negf %52 : vector<2x192xf32>
    %54 = math.exp %53 : vector<2x192xf32>
    %cst_13 = arith.constant 1.000000e+00 : f32
    %55 = vector.broadcast %cst_13 : f32 to vector<2x192xf32>
    %56 = arith.addf %55, %54 : vector<2x192xf32>
    %57 = arith.divf %55, %56 : vector<2x192xf32>
    %58 = vector.extract_strided_slice %51 {offsets = [0, 192], sizes = [2, 64], strides = [1, 1]} : vector<2x256xf32> to vector<2x64xf32>
    %59 = math.tanh %58 : vector<2x64xf32>
    %60 = vector.extract_strided_slice %57 {offsets = [0, 0], sizes = [2, 64], strides = [1, 1]} : vector<2x192xf32> to vector<2x64xf32>
    %61 = vector.extract_strided_slice %57 {offsets = [0, 64], sizes = [2, 64], strides = [1, 1]} : vector<2x192xf32> to vector<2x64xf32>
    %62 = vector.extract_strided_slice %57 {offsets = [0, 128], sizes = [2, 64], strides = [1, 1]} : vector<2x192xf32> to vector<2x64xf32>
    %63 = arith.mulf %61, %45 : vector<2x64xf32>
    %64 = arith.mulf %60, %59 : vector<2x64xf32>
    %65 = arith.addf %63, %64 : vector<2x64xf32>
    %66 = math.tanh %65 : vector<2x64xf32>
    %67 = arith.mulf %62, %66 : vector<2x64xf32>
    %68 = vector.extract_strided_slice %6 {offsets = [6, 0], sizes = [2, 256], strides = [1, 1]} : vector<16x256xf32> to vector<2x256xf32>
    %69 = arith.truncf %67 : vector<2x64xf32> to vector<2x64xbf16>
    %cst_14 = arith.constant dense<0.000000e+00> : vector<2x256xf32>
    %70 = tpu.matmul %69, %7, %cst_14 {dimension_numbers = #tpu.dot_dimension_numbers<[1], [0], [0], [1], [0, 0, 1, 1], [], []>} : vector<2x64xbf16>, vector<64x256xbf16>, vector<2x256xf32> -> vector<2x256xf32>
    %71 = arith.addf %68, %70 : vector<2x256xf32>
    %72 = vector.extract_strided_slice %71 {offsets = [0, 0], sizes = [2, 192], strides = [1, 1]} : vector<2x256xf32> to vector<2x192xf32>
    %73 = arith.negf %72 : vector<2x192xf32>
    %74 = math.exp %73 : vector<2x192xf32>
    %cst_15 = arith.constant 1.000000e+00 : f32
    %75 = vector.broadcast %cst_15 : f32 to vector<2x192xf32>
    %76 = arith.addf %75, %74 : vector<2x192xf32>
    %77 = arith.divf %75, %76 : vector<2x192xf32>
    %78 = vector.extract_strided_slice %71 {offsets = [0, 192], sizes = [2, 64], strides = [1, 1]} : vector<2x256xf32> to vector<2x64xf32>
    %79 = math.tanh %78 : vector<2x64xf32>
    %80 = vector.extract_strided_slice %77 {offsets = [0, 0], sizes = [2, 64], strides = [1, 1]} : vector<2x192xf32> to vector<2x64xf32>
    %81 = vector.extract_strided_slice %77 {offsets = [0, 64], sizes = [2, 64], strides = [1, 1]} : vector<2x192xf32> to vector<2x64xf32>
    %82 = vector.extract_strided_slice %77 {offsets = [0, 128], sizes = [2, 64], strides = [1, 1]} : vector<2x192xf32> to vector<2x64xf32>
    %83 = arith.mulf %81, %65 : vector<2x64xf32>
    %84 = arith.mulf %80, %79 : vector<2x64xf32>
    %85 = arith.addf %83, %84 : vector<2x64xf32>
    %86 = math.tanh %85 : vector<2x64xf32>
    %87 = arith.mulf %82, %86 : vector<2x64xf32>
    %88 = vector.extract_strided_slice %6 {offsets = [8, 0], sizes = [2, 256], strides = [1, 1]} : vector<16x256xf32> to vector<2x256xf32>
    %89 = arith.truncf %87 : vector<2x64xf32> to vector<2x64xbf16>
    %cst_16 = arith.constant dense<0.000000e+00> : vector<2x256xf32>
    %90 = tpu.matmul %89, %7, %cst_16 {dimension_numbers = #tpu.dot_dimension_numbers<[1], [0], [0], [1], [0, 0, 1, 1], [], []>} : vector<2x64xbf16>, vector<64x256xbf16>, vector<2x256xf32> -> vector<2x256xf32>
    %91 = arith.addf %88, %90 : vector<2x256xf32>
    %92 = vector.extract_strided_slice %91 {offsets = [0, 0], sizes = [2, 192], strides = [1, 1]} : vector<2x256xf32> to vector<2x192xf32>
    %93 = arith.negf %92 : vector<2x192xf32>
    %94 = math.exp %93 : vector<2x192xf32>
    %cst_17 = arith.constant 1.000000e+00 : f32
    %95 = vector.broadcast %cst_17 : f32 to vector<2x192xf32>
    %96 = arith.addf %95, %94 : vector<2x192xf32>
    %97 = arith.divf %95, %96 : vector<2x192xf32>
    %98 = vector.extract_strided_slice %91 {offsets = [0, 192], sizes = [2, 64], strides = [1, 1]} : vector<2x256xf32> to vector<2x64xf32>
    %99 = math.tanh %98 : vector<2x64xf32>
    %100 = vector.extract_strided_slice %97 {offsets = [0, 0], sizes = [2, 64], strides = [1, 1]} : vector<2x192xf32> to vector<2x64xf32>
    %101 = vector.extract_strided_slice %97 {offsets = [0, 64], sizes = [2, 64], strides = [1, 1]} : vector<2x192xf32> to vector<2x64xf32>
    %102 = vector.extract_strided_slice %97 {offsets = [0, 128], sizes = [2, 64], strides = [1, 1]} : vector<2x192xf32> to vector<2x64xf32>
    %103 = arith.mulf %101, %85 : vector<2x64xf32>
    %104 = arith.mulf %100, %99 : vector<2x64xf32>
    %105 = arith.addf %103, %104 : vector<2x64xf32>
    %106 = math.tanh %105 : vector<2x64xf32>
    %107 = arith.mulf %102, %106 : vector<2x64xf32>
    %108 = vector.extract_strided_slice %6 {offsets = [10, 0], sizes = [2, 256], strides = [1, 1]} : vector<16x256xf32> to vector<2x256xf32>
    %109 = arith.truncf %107 : vector<2x64xf32> to vector<2x64xbf16>
    %cst_18 = arith.constant dense<0.000000e+00> : vector<2x256xf32>
    %110 = tpu.matmul %109, %7, %cst_18 {dimension_numbers = #tpu.dot_dimension_numbers<[1], [0], [0], [1], [0, 0, 1, 1], [], []>} : vector<2x64xbf16>, vector<64x256xbf16>, vector<2x256xf32> -> vector<2x256xf32>
    %111 = arith.addf %108, %110 : vector<2x256xf32>
    %112 = vector.extract_strided_slice %111 {offsets = [0, 0], sizes = [2, 192], strides = [1, 1]} : vector<2x256xf32> to vector<2x192xf32>
    %113 = arith.negf %112 : vector<2x192xf32>
    %114 = math.exp %113 : vector<2x192xf32>
    %cst_19 = arith.constant 1.000000e+00 : f32
    %115 = vector.broadcast %cst_19 : f32 to vector<2x192xf32>
    %116 = arith.addf %115, %114 : vector<2x192xf32>
    %117 = arith.divf %115, %116 : vector<2x192xf32>
    %118 = vector.extract_strided_slice %111 {offsets = [0, 192], sizes = [2, 64], strides = [1, 1]} : vector<2x256xf32> to vector<2x64xf32>
    %119 = math.tanh %118 : vector<2x64xf32>
    %120 = vector.extract_strided_slice %117 {offsets = [0, 0], sizes = [2, 64], strides = [1, 1]} : vector<2x192xf32> to vector<2x64xf32>
    %121 = vector.extract_strided_slice %117 {offsets = [0, 64], sizes = [2, 64], strides = [1, 1]} : vector<2x192xf32> to vector<2x64xf32>
    %122 = vector.extract_strided_slice %117 {offsets = [0, 128], sizes = [2, 64], strides = [1, 1]} : vector<2x192xf32> to vector<2x64xf32>
    %123 = arith.mulf %121, %105 : vector<2x64xf32>
    %124 = arith.mulf %120, %119 : vector<2x64xf32>
    %125 = arith.addf %123, %124 : vector<2x64xf32>
    %126 = math.tanh %125 : vector<2x64xf32>
    %127 = arith.mulf %122, %126 : vector<2x64xf32>
    %128 = vector.extract_strided_slice %6 {offsets = [12, 0], sizes = [2, 256], strides = [1, 1]} : vector<16x256xf32> to vector<2x256xf32>
    %129 = arith.truncf %127 : vector<2x64xf32> to vector<2x64xbf16>
    %cst_20 = arith.constant dense<0.000000e+00> : vector<2x256xf32>
    %130 = tpu.matmul %129, %7, %cst_20 {dimension_numbers = #tpu.dot_dimension_numbers<[1], [0], [0], [1], [0, 0, 1, 1], [], []>} : vector<2x64xbf16>, vector<64x256xbf16>, vector<2x256xf32> -> vector<2x256xf32>
    %131 = arith.addf %128, %130 : vector<2x256xf32>
    %132 = vector.extract_strided_slice %131 {offsets = [0, 0], sizes = [2, 192], strides = [1, 1]} : vector<2x256xf32> to vector<2x192xf32>
    %133 = arith.negf %132 : vector<2x192xf32>
    %134 = math.exp %133 : vector<2x192xf32>
    %cst_21 = arith.constant 1.000000e+00 : f32
    %135 = vector.broadcast %cst_21 : f32 to vector<2x192xf32>
    %136 = arith.addf %135, %134 : vector<2x192xf32>
    %137 = arith.divf %135, %136 : vector<2x192xf32>
    %138 = vector.extract_strided_slice %131 {offsets = [0, 192], sizes = [2, 64], strides = [1, 1]} : vector<2x256xf32> to vector<2x64xf32>
    %139 = math.tanh %138 : vector<2x64xf32>
    %140 = vector.extract_strided_slice %137 {offsets = [0, 0], sizes = [2, 64], strides = [1, 1]} : vector<2x192xf32> to vector<2x64xf32>
    %141 = vector.extract_strided_slice %137 {offsets = [0, 64], sizes = [2, 64], strides = [1, 1]} : vector<2x192xf32> to vector<2x64xf32>
    %142 = vector.extract_strided_slice %137 {offsets = [0, 128], sizes = [2, 64], strides = [1, 1]} : vector<2x192xf32> to vector<2x64xf32>
    %143 = arith.mulf %141, %125 : vector<2x64xf32>
    %144 = arith.mulf %140, %139 : vector<2x64xf32>
    %145 = arith.addf %143, %144 : vector<2x64xf32>
    %146 = math.tanh %145 : vector<2x64xf32>
    %147 = arith.mulf %142, %146 : vector<2x64xf32>
    %148 = vector.extract_strided_slice %6 {offsets = [14, 0], sizes = [2, 256], strides = [1, 1]} : vector<16x256xf32> to vector<2x256xf32>
    %149 = arith.truncf %147 : vector<2x64xf32> to vector<2x64xbf16>
    %cst_22 = arith.constant dense<0.000000e+00> : vector<2x256xf32>
    %150 = tpu.matmul %149, %7, %cst_22 {dimension_numbers = #tpu.dot_dimension_numbers<[1], [0], [0], [1], [0, 0, 1, 1], [], []>} : vector<2x64xbf16>, vector<64x256xbf16>, vector<2x256xf32> -> vector<2x256xf32>
    %151 = arith.addf %148, %150 : vector<2x256xf32>
    %152 = vector.extract_strided_slice %151 {offsets = [0, 0], sizes = [2, 192], strides = [1, 1]} : vector<2x256xf32> to vector<2x192xf32>
    %153 = arith.negf %152 : vector<2x192xf32>
    %154 = math.exp %153 : vector<2x192xf32>
    %cst_23 = arith.constant 1.000000e+00 : f32
    %155 = vector.broadcast %cst_23 : f32 to vector<2x192xf32>
    %156 = arith.addf %155, %154 : vector<2x192xf32>
    %157 = arith.divf %155, %156 : vector<2x192xf32>
    %158 = vector.extract_strided_slice %151 {offsets = [0, 192], sizes = [2, 64], strides = [1, 1]} : vector<2x256xf32> to vector<2x64xf32>
    %159 = math.tanh %158 : vector<2x64xf32>
    %160 = vector.extract_strided_slice %157 {offsets = [0, 0], sizes = [2, 64], strides = [1, 1]} : vector<2x192xf32> to vector<2x64xf32>
    %161 = vector.extract_strided_slice %157 {offsets = [0, 64], sizes = [2, 64], strides = [1, 1]} : vector<2x192xf32> to vector<2x64xf32>
    %162 = vector.extract_strided_slice %157 {offsets = [0, 128], sizes = [2, 64], strides = [1, 1]} : vector<2x192xf32> to vector<2x64xf32>
    %163 = arith.mulf %161, %145 : vector<2x64xf32>
    %164 = arith.mulf %160, %159 : vector<2x64xf32>
    %165 = arith.addf %163, %164 : vector<2x64xf32>
    %166 = math.tanh %165 : vector<2x64xf32>
    %167 = arith.mulf %162, %166 : vector<2x64xf32>
    %168 = tpu.concatenate %27, %47, %67, %87, %107, %127, %147, %167 in 0 : vector<2x64xf32>, vector<2x64xf32>, vector<2x64xf32>, vector<2x64xf32>, vector<2x64xf32>, vector<2x64xf32>, vector<2x64xf32>, vector<2x64xf32> -> vector<16x64xf32>
    %169 = arith.truncf %168 : vector<16x64xf32> to vector<16x64xbf16>
    %c0_24 = arith.constant 0 : index
    %c0_25 = arith.constant 0 : index
    %170 = vector.load %arg4[%c0_24, %c0_25] : memref<64x256xbf16, #tpu.memory_space<vmem>>, vector<64x256xbf16>
    %cst_26 = arith.constant dense<0.000000e+00> : vector<16x256xf32>
    %171 = tpu.matmul %169, %170, %cst_26 {dimension_numbers = #tpu.dot_dimension_numbers<[1], [0], [0], [1], [0, 0, 1, 1], [], []>} : vector<16x64xbf16>, vector<64x256xbf16>, vector<16x256xf32> -> vector<16x256xf32>
    %c0_27 = arith.constant 0 : index
    %c0_28 = arith.constant 0 : index
    %172 = vector.load %arg6[%c0_27, %c0_28] : memref<1x256xf32, #tpu.memory_space<vmem>>, vector<1x256xf32>
    %173 = vector.broadcast %172 : vector<1x256xf32> to vector<16x256xf32>
    %174 = arith.addf %171, %173 : vector<16x256xf32>
    %c0_29 = arith.constant 0 : index
    %c0_30 = arith.constant 0 : index
    %175 = vector.load %arg5[%c0_29, %c0_30] : memref<64x256xbf16, #tpu.memory_space<vmem>>, vector<64x256xbf16>
    %176 = vector.extract_strided_slice %174 {offsets = [0, 0], sizes = [2, 256], strides = [1, 1]} : vector<16x256xf32> to vector<2x256xf32>
    %177 = arith.truncf %0 : vector<2x64xf32> to vector<2x64xbf16>
    %cst_31 = arith.constant dense<0.000000e+00> : vector<2x256xf32>
    %178 = tpu.matmul %177, %175, %cst_31 {dimension_numbers = #tpu.dot_dimension_numbers<[1], [0], [0], [1], [0, 0, 1, 1], [], []>} : vector<2x64xbf16>, vector<64x256xbf16>, vector<2x256xf32> -> vector<2x256xf32>
    %179 = arith.addf %176, %178 : vector<2x256xf32>
    %180 = vector.extract_strided_slice %179 {offsets = [0, 0], sizes = [2, 192], strides = [1, 1]} : vector<2x256xf32> to vector<2x192xf32>
    %181 = arith.negf %180 : vector<2x192xf32>
    %182 = math.exp %181 : vector<2x192xf32>
    %cst_32 = arith.constant 1.000000e+00 : f32
    %183 = vector.broadcast %cst_32 : f32 to vector<2x192xf32>
    %184 = arith.addf %183, %182 : vector<2x192xf32>
    %185 = arith.divf %183, %184 : vector<2x192xf32>
    %186 = vector.extract_strided_slice %179 {offsets = [0, 192], sizes = [2, 64], strides = [1, 1]} : vector<2x256xf32> to vector<2x64xf32>
    %187 = math.tanh %186 : vector<2x64xf32>
    %188 = vector.extract_strided_slice %185 {offsets = [0, 0], sizes = [2, 64], strides = [1, 1]} : vector<2x192xf32> to vector<2x64xf32>
    %189 = vector.extract_strided_slice %185 {offsets = [0, 64], sizes = [2, 64], strides = [1, 1]} : vector<2x192xf32> to vector<2x64xf32>
    %190 = vector.extract_strided_slice %185 {offsets = [0, 128], sizes = [2, 64], strides = [1, 1]} : vector<2x192xf32> to vector<2x64xf32>
    %191 = arith.mulf %189, %0 : vector<2x64xf32>
    %192 = arith.mulf %188, %187 : vector<2x64xf32>
    %193 = arith.addf %191, %192 : vector<2x64xf32>
    %194 = math.tanh %193 : vector<2x64xf32>
    %195 = arith.mulf %190, %194 : vector<2x64xf32>
    %196 = vector.extract_strided_slice %174 {offsets = [2, 0], sizes = [2, 256], strides = [1, 1]} : vector<16x256xf32> to vector<2x256xf32>
    %197 = arith.truncf %195 : vector<2x64xf32> to vector<2x64xbf16>
    %cst_33 = arith.constant dense<0.000000e+00> : vector<2x256xf32>
    %198 = tpu.matmul %197, %175, %cst_33 {dimension_numbers = #tpu.dot_dimension_numbers<[1], [0], [0], [1], [0, 0, 1, 1], [], []>} : vector<2x64xbf16>, vector<64x256xbf16>, vector<2x256xf32> -> vector<2x256xf32>
    %199 = arith.addf %196, %198 : vector<2x256xf32>
    %200 = vector.extract_strided_slice %199 {offsets = [0, 0], sizes = [2, 192], strides = [1, 1]} : vector<2x256xf32> to vector<2x192xf32>
    %201 = arith.negf %200 : vector<2x192xf32>
    %202 = math.exp %201 : vector<2x192xf32>
    %cst_34 = arith.constant 1.000000e+00 : f32
    %203 = vector.broadcast %cst_34 : f32 to vector<2x192xf32>
    %204 = arith.addf %203, %202 : vector<2x192xf32>
    %205 = arith.divf %203, %204 : vector<2x192xf32>
    %206 = vector.extract_strided_slice %199 {offsets = [0, 192], sizes = [2, 64], strides = [1, 1]} : vector<2x256xf32> to vector<2x64xf32>
    %207 = math.tanh %206 : vector<2x64xf32>
    %208 = vector.extract_strided_slice %205 {offsets = [0, 0], sizes = [2, 64], strides = [1, 1]} : vector<2x192xf32> to vector<2x64xf32>
    %209 = vector.extract_strided_slice %205 {offsets = [0, 64], sizes = [2, 64], strides = [1, 1]} : vector<2x192xf32> to vector<2x64xf32>
    %210 = vector.extract_strided_slice %205 {offsets = [0, 128], sizes = [2, 64], strides = [1, 1]} : vector<2x192xf32> to vector<2x64xf32>
    %211 = arith.mulf %209, %193 : vector<2x64xf32>
    %212 = arith.mulf %208, %207 : vector<2x64xf32>
    %213 = arith.addf %211, %212 : vector<2x64xf32>
    %214 = math.tanh %213 : vector<2x64xf32>
    %215 = arith.mulf %210, %214 : vector<2x64xf32>
    %216 = vector.extract_strided_slice %174 {offsets = [4, 0], sizes = [2, 256], strides = [1, 1]} : vector<16x256xf32> to vector<2x256xf32>
    %217 = arith.truncf %215 : vector<2x64xf32> to vector<2x64xbf16>
    %cst_35 = arith.constant dense<0.000000e+00> : vector<2x256xf32>
    %218 = tpu.matmul %217, %175, %cst_35 {dimension_numbers = #tpu.dot_dimension_numbers<[1], [0], [0], [1], [0, 0, 1, 1], [], []>} : vector<2x64xbf16>, vector<64x256xbf16>, vector<2x256xf32> -> vector<2x256xf32>
    %219 = arith.addf %216, %218 : vector<2x256xf32>
    %220 = vector.extract_strided_slice %219 {offsets = [0, 0], sizes = [2, 192], strides = [1, 1]} : vector<2x256xf32> to vector<2x192xf32>
    %221 = arith.negf %220 : vector<2x192xf32>
    %222 = math.exp %221 : vector<2x192xf32>
    %cst_36 = arith.constant 1.000000e+00 : f32
    %223 = vector.broadcast %cst_36 : f32 to vector<2x192xf32>
    %224 = arith.addf %223, %222 : vector<2x192xf32>
    %225 = arith.divf %223, %224 : vector<2x192xf32>
    %226 = vector.extract_strided_slice %219 {offsets = [0, 192], sizes = [2, 64], strides = [1, 1]} : vector<2x256xf32> to vector<2x64xf32>
    %227 = math.tanh %226 : vector<2x64xf32>
    %228 = vector.extract_strided_slice %225 {offsets = [0, 0], sizes = [2, 64], strides = [1, 1]} : vector<2x192xf32> to vector<2x64xf32>
    %229 = vector.extract_strided_slice %225 {offsets = [0, 64], sizes = [2, 64], strides = [1, 1]} : vector<2x192xf32> to vector<2x64xf32>
    %230 = vector.extract_strided_slice %225 {offsets = [0, 128], sizes = [2, 64], strides = [1, 1]} : vector<2x192xf32> to vector<2x64xf32>
    %231 = arith.mulf %229, %213 : vector<2x64xf32>
    %232 = arith.mulf %228, %227 : vector<2x64xf32>
    %233 = arith.addf %231, %232 : vector<2x64xf32>
    %234 = math.tanh %233 : vector<2x64xf32>
    %235 = arith.mulf %230, %234 : vector<2x64xf32>
    %236 = vector.extract_strided_slice %174 {offsets = [6, 0], sizes = [2, 256], strides = [1, 1]} : vector<16x256xf32> to vector<2x256xf32>
    %237 = arith.truncf %235 : vector<2x64xf32> to vector<2x64xbf16>
    %cst_37 = arith.constant dense<0.000000e+00> : vector<2x256xf32>
    %238 = tpu.matmul %237, %175, %cst_37 {dimension_numbers = #tpu.dot_dimension_numbers<[1], [0], [0], [1], [0, 0, 1, 1], [], []>} : vector<2x64xbf16>, vector<64x256xbf16>, vector<2x256xf32> -> vector<2x256xf32>
    %239 = arith.addf %236, %238 : vector<2x256xf32>
    %240 = vector.extract_strided_slice %239 {offsets = [0, 0], sizes = [2, 192], strides = [1, 1]} : vector<2x256xf32> to vector<2x192xf32>
    %241 = arith.negf %240 : vector<2x192xf32>
    %242 = math.exp %241 : vector<2x192xf32>
    %cst_38 = arith.constant 1.000000e+00 : f32
    %243 = vector.broadcast %cst_38 : f32 to vector<2x192xf32>
    %244 = arith.addf %243, %242 : vector<2x192xf32>
    %245 = arith.divf %243, %244 : vector<2x192xf32>
    %246 = vector.extract_strided_slice %239 {offsets = [0, 192], sizes = [2, 64], strides = [1, 1]} : vector<2x256xf32> to vector<2x64xf32>
    %247 = math.tanh %246 : vector<2x64xf32>
    %248 = vector.extract_strided_slice %245 {offsets = [0, 0], sizes = [2, 64], strides = [1, 1]} : vector<2x192xf32> to vector<2x64xf32>
    %249 = vector.extract_strided_slice %245 {offsets = [0, 64], sizes = [2, 64], strides = [1, 1]} : vector<2x192xf32> to vector<2x64xf32>
    %250 = vector.extract_strided_slice %245 {offsets = [0, 128], sizes = [2, 64], strides = [1, 1]} : vector<2x192xf32> to vector<2x64xf32>
    %251 = arith.mulf %249, %233 : vector<2x64xf32>
    %252 = arith.mulf %248, %247 : vector<2x64xf32>
    %253 = arith.addf %251, %252 : vector<2x64xf32>
    %254 = math.tanh %253 : vector<2x64xf32>
    %255 = arith.mulf %250, %254 : vector<2x64xf32>
    %256 = vector.extract_strided_slice %174 {offsets = [8, 0], sizes = [2, 256], strides = [1, 1]} : vector<16x256xf32> to vector<2x256xf32>
    %257 = arith.truncf %255 : vector<2x64xf32> to vector<2x64xbf16>
    %cst_39 = arith.constant dense<0.000000e+00> : vector<2x256xf32>
    %258 = tpu.matmul %257, %175, %cst_39 {dimension_numbers = #tpu.dot_dimension_numbers<[1], [0], [0], [1], [0, 0, 1, 1], [], []>} : vector<2x64xbf16>, vector<64x256xbf16>, vector<2x256xf32> -> vector<2x256xf32>
    %259 = arith.addf %256, %258 : vector<2x256xf32>
    %260 = vector.extract_strided_slice %259 {offsets = [0, 0], sizes = [2, 192], strides = [1, 1]} : vector<2x256xf32> to vector<2x192xf32>
    %261 = arith.negf %260 : vector<2x192xf32>
    %262 = math.exp %261 : vector<2x192xf32>
    %cst_40 = arith.constant 1.000000e+00 : f32
    %263 = vector.broadcast %cst_40 : f32 to vector<2x192xf32>
    %264 = arith.addf %263, %262 : vector<2x192xf32>
    %265 = arith.divf %263, %264 : vector<2x192xf32>
    %266 = vector.extract_strided_slice %259 {offsets = [0, 192], sizes = [2, 64], strides = [1, 1]} : vector<2x256xf32> to vector<2x64xf32>
    %267 = math.tanh %266 : vector<2x64xf32>
    %268 = vector.extract_strided_slice %265 {offsets = [0, 0], sizes = [2, 64], strides = [1, 1]} : vector<2x192xf32> to vector<2x64xf32>
    %269 = vector.extract_strided_slice %265 {offsets = [0, 64], sizes = [2, 64], strides = [1, 1]} : vector<2x192xf32> to vector<2x64xf32>
    %270 = vector.extract_strided_slice %265 {offsets = [0, 128], sizes = [2, 64], strides = [1, 1]} : vector<2x192xf32> to vector<2x64xf32>
    %271 = arith.mulf %269, %253 : vector<2x64xf32>
    %272 = arith.mulf %268, %267 : vector<2x64xf32>
    %273 = arith.addf %271, %272 : vector<2x64xf32>
    %274 = math.tanh %273 : vector<2x64xf32>
    %275 = arith.mulf %270, %274 : vector<2x64xf32>
    %276 = vector.extract_strided_slice %174 {offsets = [10, 0], sizes = [2, 256], strides = [1, 1]} : vector<16x256xf32> to vector<2x256xf32>
    %277 = arith.truncf %275 : vector<2x64xf32> to vector<2x64xbf16>
    %cst_41 = arith.constant dense<0.000000e+00> : vector<2x256xf32>
    %278 = tpu.matmul %277, %175, %cst_41 {dimension_numbers = #tpu.dot_dimension_numbers<[1], [0], [0], [1], [0, 0, 1, 1], [], []>} : vector<2x64xbf16>, vector<64x256xbf16>, vector<2x256xf32> -> vector<2x256xf32>
    %279 = arith.addf %276, %278 : vector<2x256xf32>
    %280 = vector.extract_strided_slice %279 {offsets = [0, 0], sizes = [2, 192], strides = [1, 1]} : vector<2x256xf32> to vector<2x192xf32>
    %281 = arith.negf %280 : vector<2x192xf32>
    %282 = math.exp %281 : vector<2x192xf32>
    %cst_42 = arith.constant 1.000000e+00 : f32
    %283 = vector.broadcast %cst_42 : f32 to vector<2x192xf32>
    %284 = arith.addf %283, %282 : vector<2x192xf32>
    %285 = arith.divf %283, %284 : vector<2x192xf32>
    %286 = vector.extract_strided_slice %279 {offsets = [0, 192], sizes = [2, 64], strides = [1, 1]} : vector<2x256xf32> to vector<2x64xf32>
    %287 = math.tanh %286 : vector<2x64xf32>
    %288 = vector.extract_strided_slice %285 {offsets = [0, 0], sizes = [2, 64], strides = [1, 1]} : vector<2x192xf32> to vector<2x64xf32>
    %289 = vector.extract_strided_slice %285 {offsets = [0, 64], sizes = [2, 64], strides = [1, 1]} : vector<2x192xf32> to vector<2x64xf32>
    %290 = vector.extract_strided_slice %285 {offsets = [0, 128], sizes = [2, 64], strides = [1, 1]} : vector<2x192xf32> to vector<2x64xf32>
    %291 = arith.mulf %289, %273 : vector<2x64xf32>
    %292 = arith.mulf %288, %287 : vector<2x64xf32>
    %293 = arith.addf %291, %292 : vector<2x64xf32>
    %294 = math.tanh %293 : vector<2x64xf32>
    %295 = arith.mulf %290, %294 : vector<2x64xf32>
    %296 = vector.extract_strided_slice %174 {offsets = [12, 0], sizes = [2, 256], strides = [1, 1]} : vector<16x256xf32> to vector<2x256xf32>
    %297 = arith.truncf %295 : vector<2x64xf32> to vector<2x64xbf16>
    %cst_43 = arith.constant dense<0.000000e+00> : vector<2x256xf32>
    %298 = tpu.matmul %297, %175, %cst_43 {dimension_numbers = #tpu.dot_dimension_numbers<[1], [0], [0], [1], [0, 0, 1, 1], [], []>} : vector<2x64xbf16>, vector<64x256xbf16>, vector<2x256xf32> -> vector<2x256xf32>
    %299 = arith.addf %296, %298 : vector<2x256xf32>
    %300 = vector.extract_strided_slice %299 {offsets = [0, 0], sizes = [2, 192], strides = [1, 1]} : vector<2x256xf32> to vector<2x192xf32>
    %301 = arith.negf %300 : vector<2x192xf32>
    %302 = math.exp %301 : vector<2x192xf32>
    %cst_44 = arith.constant 1.000000e+00 : f32
    %303 = vector.broadcast %cst_44 : f32 to vector<2x192xf32>
    %304 = arith.addf %303, %302 : vector<2x192xf32>
    %305 = arith.divf %303, %304 : vector<2x192xf32>
    %306 = vector.extract_strided_slice %299 {offsets = [0, 192], sizes = [2, 64], strides = [1, 1]} : vector<2x256xf32> to vector<2x64xf32>
    %307 = math.tanh %306 : vector<2x64xf32>
    %308 = vector.extract_strided_slice %305 {offsets = [0, 0], sizes = [2, 64], strides = [1, 1]} : vector<2x192xf32> to vector<2x64xf32>
    %309 = vector.extract_strided_slice %305 {offsets = [0, 64], sizes = [2, 64], strides = [1, 1]} : vector<2x192xf32> to vector<2x64xf32>
    %310 = vector.extract_strided_slice %305 {offsets = [0, 128], sizes = [2, 64], strides = [1, 1]} : vector<2x192xf32> to vector<2x64xf32>
    %311 = arith.mulf %309, %293 : vector<2x64xf32>
    %312 = arith.mulf %308, %307 : vector<2x64xf32>
    %313 = arith.addf %311, %312 : vector<2x64xf32>
    %314 = math.tanh %313 : vector<2x64xf32>
    %315 = arith.mulf %310, %314 : vector<2x64xf32>
    %316 = vector.extract_strided_slice %174 {offsets = [14, 0], sizes = [2, 256], strides = [1, 1]} : vector<16x256xf32> to vector<2x256xf32>
    %317 = arith.truncf %315 : vector<2x64xf32> to vector<2x64xbf16>
    %cst_45 = arith.constant dense<0.000000e+00> : vector<2x256xf32>
    %318 = tpu.matmul %317, %175, %cst_45 {dimension_numbers = #tpu.dot_dimension_numbers<[1], [0], [0], [1], [0, 0, 1, 1], [], []>} : vector<2x64xbf16>, vector<64x256xbf16>, vector<2x256xf32> -> vector<2x256xf32>
    %319 = arith.addf %316, %318 : vector<2x256xf32>
    %320 = vector.extract_strided_slice %319 {offsets = [0, 0], sizes = [2, 192], strides = [1, 1]} : vector<2x256xf32> to vector<2x192xf32>
    %321 = arith.negf %320 : vector<2x192xf32>
    %322 = math.exp %321 : vector<2x192xf32>
    %cst_46 = arith.constant 1.000000e+00 : f32
    %323 = vector.broadcast %cst_46 : f32 to vector<2x192xf32>
    %324 = arith.addf %323, %322 : vector<2x192xf32>
    %325 = arith.divf %323, %324 : vector<2x192xf32>
    %326 = vector.extract_strided_slice %319 {offsets = [0, 192], sizes = [2, 64], strides = [1, 1]} : vector<2x256xf32> to vector<2x64xf32>
    %327 = math.tanh %326 : vector<2x64xf32>
    %328 = vector.extract_strided_slice %325 {offsets = [0, 0], sizes = [2, 64], strides = [1, 1]} : vector<2x192xf32> to vector<2x64xf32>
    %329 = vector.extract_strided_slice %325 {offsets = [0, 64], sizes = [2, 64], strides = [1, 1]} : vector<2x192xf32> to vector<2x64xf32>
    %330 = vector.extract_strided_slice %325 {offsets = [0, 128], sizes = [2, 64], strides = [1, 1]} : vector<2x192xf32> to vector<2x64xf32>
    %331 = arith.mulf %329, %313 : vector<2x64xf32>
    %332 = arith.mulf %328, %327 : vector<2x64xf32>
    %333 = arith.addf %331, %332 : vector<2x64xf32>
    %334 = math.tanh %333 : vector<2x64xf32>
    %335 = arith.mulf %330, %334 : vector<2x64xf32>
    %c0_47 = arith.constant 0 : index
    %c0_48 = arith.constant 0 : index
    %336 = vector.load %arg7[%c0_47, %c0_48] : memref<64x2xf32, #tpu.memory_space<vmem>>, vector<64x2xf32>
    %cst_49 = arith.constant dense<0.000000e+00> : vector<2x2xf32>
    %337 = tpu.matmul %335, %336, %cst_49 {dimension_numbers = #tpu.dot_dimension_numbers<[1], [0], [0], [1], [0, 0, 1, 1], [], []>} : vector<2x64xf32>, vector<64x2xf32>, vector<2x2xf32> -> vector<2x2xf32>
    %c0_50 = arith.constant 0 : index
    %c0_51 = arith.constant 0 : index
    %338 = vector.load %arg8[%c0_50, %c0_51] : memref<1x2xf32, #tpu.memory_space<vmem>>, vector<1x2xf32>
    %339 = vector.broadcast %338 : vector<1x2xf32> to vector<2x2xf32>
    %340 = arith.addf %337, %339 : vector<2x2xf32>
    %341 = vector.extract_strided_slice %340 {offsets = [0, 0], sizes = [2, 1], strides = [1, 1]} : vector<2x2xf32> to vector<2x1xf32>
    %342 = vector.extract_strided_slice %340 {offsets = [0, 1], sizes = [2, 1], strides = [1, 1]} : vector<2x2xf32> to vector<2x1xf32>
    %cst_52 = arith.constant 0.000000e+00 : f32
    %343 = vector.broadcast %cst_52 : f32 to vector<2x1xf32>
    %344 = arith.maximumf %342, %343 : vector<2x1xf32>
    %345 = vector.broadcast %cst_52 : f32 to vector<2x1xf32>
    %346 = arith.subf %342, %345 : vector<2x1xf32>
    %347 = arith.cmpf one, %346, %346 : vector<2x1xf32>
    %348 = vector.broadcast %cst_52 : f32 to vector<2x1xf32>
    %349 = arith.addf %342, %348 : vector<2x1xf32>
    %350 = math.absf %346 : vector<2x1xf32>
    %cst_53 = arith.constant 0.000000e+00 : f32
    %351 = vector.broadcast %cst_53 : f32 to vector<2x1xf32>
    %352 = arith.subf %351, %350 : vector<2x1xf32>
    %353 = math.exp %352 : vector<2x1xf32>
    %354 = math.log1p %353 : vector<2x1xf32>
    %355 = arith.addf %344, %354 : vector<2x1xf32>
    %356 = arith.select %347, %349, %355 : vector<2x1xi1>, vector<2x1xf32>
    %357 = tpu.concatenate %341, %356 in 1 : vector<2x1xf32>, vector<2x1xf32> -> vector<2x2xf32>
    %c0_54 = arith.constant 0 : index
    %c0_55 = arith.constant 0 : index
    %358 = vector.load %arg9[%c0_54, %c0_55] : memref<2x2xf32, #tpu.memory_space<vmem>>, vector<2x2xf32>
    tpu.vector_store %arg9[%c0_54, %c0_55], %357 {strides = array<i32>} : memref<2x2xf32, #tpu.memory_space<vmem>>, vector<2x2xf32>,
    return
  }
}

</mosaic_0001>

<bundles_post_ra>
// kernel: tpu_custom_call.1
= control target key start
LH: loop header
LB: loop body
LE: loop exit
PB: predicated region body
PF: predicated region fallthrough
CT: control target
= control target key end

     0   :  { %14 = vsyncpa [#allocation3], 0  ;;  %s2831_s0 = inlined_call_operand.vmem [shape: bf16[16,16], index: 0, kind: input, shape index: {}]   ;;  %s2832_s1 = inlined_call_operand.hbm [shape: bf16[16,256], index: 1, kind: input, shape index: {}]   ;;  %s2833_s2 = inlined_call_operand.vmem [shape: f32[1,256], index: 2, kind: input, shape index: {}]   ;;  %s2834_s3 = inlined_call_operand.vmem [shape: bf16[64,256], index: 3, kind: input, shape index: {}]   ;;  %s2835_s4 = inlined_call_operand.hbm [shape: bf16[64,256], index: 4, kind: input, shape index: {}]   ;;  %s2836_s5 = inlined_call_operand.hbm [shape: bf16[64,256], index: 5, kind: input, shape index: {}]   ;;  %s2837_s6 = inlined_call_operand.vmem [shape: f32[1,256], index: 6, kind: input, shape index: {}]   ;;  %s2838_s7 = inlined_call_operand.vmem [shape: f32[64,2], index: 7, kind: input, shape index: {}]   ;;  %s2839_s8 = inlined_call_operand.vmem [shape: f32[1,2], index: 8, kind: input, shape index: {}]   ;;  %s2840_s9 = inlined_call_operand.hbm [shape: f32[2,2], index: 9, kind: output, shape index: {}]  }
   0x1   :  { %15 = vsyncpa [#allocation6], 0 }
   0x2   :  { %16 = vsyncpa [#allocation4], 0  ;;  %s2312_s30 = smov [#allocation5]   ;;  %s2313_s11 = smov [#allocation2]  }
   0x3   :  { %s40_s10 = sshll.u32 %s2312_s30, 4  ;;  %s24_s12 = sshll.u32 %s2313_s11, 4  ;;  %s41_s10 = int_to_ptr.vmem [resolvable:$true] %s40_s10  ;;  %s2373_s12 = int_to_ptr.vmem [resolvable:$true] %s24_s12 }
   0x4   :  { %s2218_s15 = scalar_lea.hbm %s2835_s4, 1024 }
   0x5   :  { %p2219_p0 = scmp.ne.s32.totalorder %s2835_s4, %s2218_s15  ;;  %p2222_p1 = scmp.lt.u32.totalorder %s2218_s15, %s2835_s4 }
   0x7   :  { %p2224_p2 = pnand %p2222_p1, %p2219_p0 }
   0x9   :  { %2227 = shalt.err (!%p2224_p2)
}
   0xa   :  { %s2228_s20 = scalar_lea.vmem %s41_s10, 1024  ;;  %p2233_p4 = scmp.lt.s32.totalorder %s41_s10, %s41_s10 }
   0xb   :  { %p2229_p3 = scmp.ne.s32.totalorder %s41_s10, %s2228_s20  ;;  %p2234_p5 = scmp.lt.s32.totalorder %s2228_s20, %s2228_s20 }
   0xd   :  { %p2235_p6 = por %p2234_p5, %p2233_p4 }
   0xf   :  { %p2236_p7 = pnand %p2235_p6, %p2229_p3 }
  0x11   :  { %2239 = shalt.err (!%p2236_p7)
}
  0x12   :  { %s2314_s21 = smov 128   ;;  %s2315_s22 = smov 8  }
  0x13   :  { %46 = dma.hbm_to_vmem [thread:$0]  %s2835_s4, 1024, %s41_s10, [#allocation6], %s2314_s21, %s2314_s21, %s2315_s22  }
  0x14   :  { %s2240_s27 = scalar_lea.hbm %s2832_s1, 256 }
  0x15   :  { %p2241_p8 = scmp.ne.s32.totalorder %s2832_s1, %s2240_s27  ;;  %p2244_p9 = scmp.lt.u32.totalorder %s2240_s27, %s2832_s1 }
  0x17   :  { %p2246_p10 = pnand %p2244_p9, %p2241_p8 }
  0x19   :  { %2249 = shalt.err (!%p2246_p10)
}
  0x1a   :  { %s2250_s13 = scalar_lea.vmem %s2373_s12, 256  ;;  %p2255_p12 = scmp.lt.s32.totalorder %s2373_s12, %s2373_s12 }
  0x1b   :  { %p2251_p11 = scmp.ne.s32.totalorder %s2373_s12, %s2250_s13  ;;  %p2256_p13 = scmp.lt.s32.totalorder %s2250_s13, %s2250_s13 }
  0x1d   :  { %p2257_p0 = por %p2256_p13, %p2255_p12 }
  0x1f   :  { %p2258_p1 = pnand %p2257_p0, %p2251_p11 }
  0x21   :  { %2261 = shalt.err (!%p2258_p1)
}
  0x22   :  { %30 = dma.hbm_to_vmem [thread:$0]  %s2832_s1, 256, %s2373_s12, [#allocation3], %s2314_s21, %s2314_s21, %s2315_s22  }
  0x23   :  { %s2316_s14 = smov [#allocation7]   ;;  %s2262_s18 = scalar_lea.hbm %s2836_s5, 1024 }
  0x24   :  { %s52_s15 = sshll.u32 %s2316_s14, 4  ;;  %p2263_p2 = scmp.ne.s32.totalorder %s2836_s5, %s2262_s18  ;;  %s53_s15 = int_to_ptr.vmem [resolvable:$true] %s52_s15 }
  0x25   :  { %p2266_p3 = scmp.lt.u32.totalorder %s2262_s18, %s2836_s5 }
  0x27   :  { %p2268_p4 = pnand %p2266_p3, %p2263_p2 }
  0x29   :  { %2271 = shalt.err (!%p2268_p4)
}
  0x2a   :  { %s2272_s25 = scalar_lea.vmem %s53_s15, 1024  ;;  %p2277_p6 = scmp.lt.s32.totalorder %s53_s15, %s53_s15 }
  0x2b   :  { %p2273_p5 = scmp.ne.s32.totalorder %s53_s15, %s2272_s25  ;;  %p2278_p7 = scmp.lt.s32.totalorder %s2272_s25, %s2272_s25 }
  0x2d   :  { %p2279_p8 = por %p2278_p7, %p2277_p6 }
  0x2f   :  { %p2280_p9 = pnand %p2279_p8, %p2273_p5 }
  0x31   :  { %2283 = shalt.err (!%p2280_p9)
}
  0x32   :  { %58 = dma.hbm_to_vmem [thread:$0]  %s2836_s5, 1024, %s53_s15, [#allocation6], %s2314_s21, %s2314_s21, %s2315_s22  }
  0x33   :  { %2306 = dma.done.wait [#allocation3], 256  }
  0x34   :  { %2307 = vsyncadd [#allocation3], 4294967040 }
  0x35   :  { %2308 = dma.done.wait [#allocation6], 2048  }
  0x36   :  { %2309 = vsyncadd [#allocation6], 4294965248  ;;  %v2317_v0 = vmov 0   ;;  %v2430_v1 = vld [vmem:[%s2834_s3 + $0x4] ss:$8 sps:$4 sm:$0xff]   ;;  %vm106_vm0 = vcmask 130048   ;;  %v81_v12 = vlaneseq }
  0x37   :  { %142 = vmatprep.mubr.bf16.mxu0 %v2317_v0  ;;  %237 = vmatprep.mubr.bf16.mxu1 %v2317_v0  ;;  %v2435_v2 = vld [vmem:[%s2834_s3] ss:$8 sps:$4 sm:$0xff]   ;;  %v2441_v3 = vld [vmem:[%s2834_s3 + $0x14] ss:$8 sps:$4 sm:$0xff]   ;;  %v2446_v4 = vld [vmem:[%s2834_s3 + $0x10] ss:$8 sps:$4 sm:$0xff]  }
  0x38   :  { %205 = vmatprep.subr.bf16.mxu1 %v2430_v1  ;;  %v1988_v5 = vld [vmem:[#allocation2 + $0x4] ss:$8 sps:$4 sm:$0xff]   ;;  %v1990_v6 = vld [vmem:[#allocation2] ss:$8 sps:$4 sm:$0xff]   ;;  %v2467_v10 = vld [vmem:[%s2834_s3 + $0x34] ss:$8 sps:$4 sm:$0xff]  }
  0x39   :  { %206 = vmatpush1.bf16.msra.mxu1 %v2435_v2  ;;  %v2453_v7 = vld [vmem:[%s2834_s3 + $0x24] ss:$8 sps:$4 sm:$0xff]   ;;  %110 = vmatprep.subr.bf16.mxu0 %v1988_v5  ;;  %v2462_v9 = vld [vmem:[%s2834_s3 + $0x20] ss:$8 sps:$4 sm:$0xff]   ;;  %v2474_v11 = vld [vmem:[%s2834_s3 + $0x30] ss:$8 sps:$4 sm:$0xff]  }
  0x3a   :  { %207 = vmatprep.subr.bf16.mxu1 %v2441_v3  ;;  %111 = vmatpush1.bf16.msra.mxu0 %v1990_v6  ;;  %v1994_v8 = vld [vmem:[%s2831_s0] sm:$0xff]   ;;  %v2499_v13 = vshrl.u32 %v81_v12, 7  ;;  %vm201_vm1 = vcmask 523264   ;;  %vm884_vm2 = vcmask 1041408   ;;  %vm886_vm3 = vcmask 1043456  }
  0x3b   :  { %282 = vmatprep.subr.bf16.mxu0 %v2430_v1  ;;  %v79_v15 = vld [vmem:[%s2833_s2] sm:$0x3]  ;;  %s2318_s2 = smov 64   ;;  %vm888_vm4 = vcmask 1045504   ;;  %vm2320_vm5 = vmmov 0   ;;  %vm1834_vm7 = vcmask 7168  }
  0x3c   :  { %v83_v14 = vsub.s32 0, %v2499_v13  ;;  %v87_v16 = vsub.s32 1, %v2499_v13  ;;  %vm1836_vm9 = vcmask 9216  }
  0x3d   :  { %208 = vmatpush1.bf16.msra.mxu1 %v2446_v4  ;;  %1857 = vmatmul.mubr.msk.bf16.vlgmr.msra.gmra.mrb[0].mxu0 %vm106_vm0, %v1994_v8 }
  0x3e   :  { %209 = vmatprep.subr.bf16.mxu1 %v2453_v7  ;;  %283 = vmatpush1.bf16.msra.mxu0 %v2435_v2  ;;  %v84_v17 = vrot.slane %v79_v15, %v83_v14  ;;  %v88_v19 = vrot.slane %v79_v15, %v87_v16 }
  0x3f   :  { %314 = vmatprep.mubr.bf16.mxu0 %v2317_v0  ;;  %284 = vmatprep.subr.bf16.mxu0 %v2441_v3 }
  0x41   :  { %210 = vmatpush1.bf16.msra.mxu1 %v2462_v9 }
  0x42   :  { %211 = vmatprep.subr.bf16.mxu1 %v2467_v10  ;;  %285 = vmatpush1.bf16.msra.mxu0 %v2446_v4 }
  0x43   :  { %286 = vmatprep.subr.bf16.mxu0 %v2453_v7 }
  0x45   :  { %212 = vmatpush1.bf16.msra.mxu1 %v2474_v11 }
  0x46   :  { %370 = vmatprep.subr.bf16.mxu1 %v2430_v1  ;;  %287 = vmatpush1.bf16.msra.mxu0 %v2462_v9 }
  0x47   :  { %288 = vmatprep.subr.bf16.mxu0 %v2467_v10 }
  0x48   :  { %238 = vmatmul.mubr.bf16.vlgmr.msra.gmra.mrb[0].mxu1 %v2317_v0 }
  0x49   :  { %371 = vmatpush1.bf16.msra.mxu1 %v2435_v2  ;;  %402 = vmatprep.mubr.bf16.mxu1 %v2317_v0 }
  0x4a   :  { %372 = vmatprep.subr.bf16.mxu1 %v2441_v3  ;;  %289 = vmatpush1.bf16.msra.mxu0 %v2474_v11 }
  0x4b   :  { %458 = vmatprep.subr.bf16.mxu0 %v2430_v1 }
  0x4d   :  { %373 = vmatpush1.bf16.msra.mxu1 %v2446_v4 }
  0x4e   :  { %374 = vmatprep.subr.bf16.mxu1 %v2453_v7 }
  0x51   :  { %375 = vmatpush1.bf16.msra.mxu1 %v2462_v9 }
  0x52   :  { %376 = vmatprep.subr.bf16.mxu1 %v2467_v10 }
  0x55   :  { %377 = vmatpush1.bf16.msra.mxu1 %v2474_v11 }
  0x56   :  { %546 = vmatprep.subr.bf16.mxu1 %v2430_v1 }
 0x110   :  { %v144_v18 = vpop.f32.mrb[0].mxu0 }
 0x111   :  { %v146_v20 = vpop.f32.mrb[1].mxu0  ;;  %v2518_v32 = vadd.f32 %v144_v18, %v84_v17 }
 0x112   :  { %v148_v21 = vpop.f32.mrb[2].mxu0  ;;  %v2514_v25 = vadd.f32 %v146_v20, %v88_v19 }
 0x113   :  { %v2510_v22 = vadd.f32 %v148_v21, %v84_v17  ;;  %v150_v23 = vpop.f32.mrb[3].mxu0 }
 0x114   :  { %v2512_v24 = vadd.f32 %v150_v23, %v88_v19 }
 0x11b   :  { %v239_v26 = vpop.f32.mrb[0].mxu1 }
 0x11c   :  { %v241_v27 = vpop.f32.mrb[1].mxu1  ;;  %v246_v33 = vadd.f32 %v239_v26, %v2518_v32 }
 0x11d   :  { %v247_v28 = vadd.f32 %v241_v27, %v2514_v25  ;;  %v243_v29 = vpop.f32.mrb[2].mxu1 }
 0x11e   :  { %v244_v30 = vpop.f32.mrb[3].mxu1  ;;  %v1866_v34 = vmul.f32 -1.442695, %v246_v33 }
 0x11f   :  { %2022 = vtanh.f32 %v247_v28  ;;  %v1867_v44 = vmul.f32 -1.442695, %v247_v28 }
 0x120   :  { %2024 = vpow2.f32 %v1866_v34 }
 0x129   :  { %v2023_v31 = vpop.eup %2022 }
 0x12a   :  { %263 = vrot.lane.b32.xlu0 %v2023_v31, %s2318_s2  ;;  %v2025_v35 = vpop.eup %2024 }
 0x12b   :  { %v254_v36 = vadd.f32 1.0, %v2025_v35 }
 0x12d   :  { %2026 = vrcp.f32 %v254_v36 }
 0x137   :  { %v2027_v37 = vpop.eup %2026 }
 0x138   :  { %v261_v40 = vmul.f32 0.0, %v2027_v37 }
 0x19c   :  { %v264_v38 = vpop.permute.xlu0 %263 }
 0x19d   :  { %v266_v39 = vmul.f32 %v2027_v37, %v264_v38 }
 0x19f   :  { %268 = vrot.lane.b32.xlu0 %v266_v39, %s2318_s2 }
 0x211   :  { %v269_v41 = vpop.permute.xlu0 %268 }
 0x212   :  { %v271_v42 = vadd.f32 %v269_v41, %v261_v40 }
 0x214   :  { %2028 = vtanh.f32 %v271_v42  ;;  %v345_v8 = vrot.slane %v271_v42, 6 }
 0x215   :  { %2030 = vpow2.f32 %v1867_v44 }
 0x21e   :  { %v2029_v43 = vpop.eup %2028 }
 0x21f   :  { %274 = vrot.lane.b32.xlu1 %v2029_v43, %s2318_s2  ;;  %v2031_v45 = vpop.eup %2030 }
 0x220   :  { %v255_v46 = vadd.f32 1.0, %v2031_v45 }
 0x222   :  { %2032 = vrcp.f32 %v255_v46 }
 0x22c   :  { %v2033_v47 = vpop.eup %2032 }
 0x291   :  { %v275_v48 = vpop.permute.xlu1 %274 }
 0x292   :  { %v2523_v49 = vmul.f32 %v2033_v47, %v275_v48 }
 0x294   :  { %v278_v50 = vpack.c.bf16 %v2523_v49, %v2523_v49 }
 0x296   :  { %1868 = vmatmul.mubr.msk.bf16.vlgmr.msra.gmra.mrb[4].mxu0 %vm201_vm1, %v278_v50 }
 0x297   :  { %459 = vmatpush1.bf16.msra.mxu0 %v2435_v2  ;;  %490 = vmatprep.mubr.bf16.mxu0 %v2317_v0 }
 0x298   :  { %460 = vmatprep.subr.bf16.mxu0 %v2441_v3 }
 0x29b   :  { %461 = vmatpush1.bf16.msra.mxu0 %v2446_v4 }
 0x29c   :  { %462 = vmatprep.subr.bf16.mxu0 %v2453_v7 }
 0x29f   :  { %463 = vmatpush1.bf16.msra.mxu0 %v2462_v9 }
 0x2a0   :  { %464 = vmatprep.subr.bf16.mxu0 %v2467_v10 }
 0x2a3   :  { %465 = vmatpush1.bf16.msra.mxu0 %v2474_v11 }
 0x2a4   :  { %626 = vmatprep.subr.bf16.mxu0 %v2430_v1 }
 0x369   :  { %v316_v51 = vpop.f32.mrb[4].mxu0 }
 0x36a   :  { %v318_v52 = vpop.f32.mrb[5].mxu0  ;;  %v325_v58 = vrot.slane %v316_v51, 6 }
 0x36b   :  { %v326_v53 = vrot.slane %v318_v52, 6  ;;  %v320_v54 = vpop.f32.mrb[6].mxu0 }
 0x36c   :  { %v321_v55 = vpop.f32.mrb[7].mxu0  ;;  %v329_v59 = vadd.f32 %v325_v58, %v2518_v32 }
 0x36d   :  { %v330_v56 = vadd.f32 %v326_v53, %v2514_v25 }
 0x36e   :  { %v1869_v60 = vmul.f32 -1.442695, %v329_v59 }
 0x36f   :  { %2034 = vtanh.f32 %v330_v56  ;;  %v1870_v19 = vmul.f32 -1.442695, %v330_v56 }
 0x370   :  { %2036 = vpow2.f32 %v1869_v60 }
 0x379   :  { %v2035_v57 = vpop.eup %2034 }
 0x37a   :  { %349 = vrot.lane.b32.xlu1 %v2035_v57, %s2318_s2  ;;  %v2037_v61 = vpop.eup %2036 }
 0x37b   :  { %v337_v62 = vadd.f32 1.0, %v2037_v61 }
 0x37d   :  { %2038 = vrcp.f32 %v337_v62 }
 0x387   :  { %v2039_v63 = vpop.eup %2038 }
 0x388   :  { %v347_v12 = vmul.f32 %v2039_v63, %v345_v8 }
 0x3ec   :  { %v350_v5 = vpop.permute.xlu1 %349 }
 0x3ed   :  { %v352_v6 = vmul.f32 %v2039_v63, %v350_v5 }
 0x3ef   :  { %354 = vrot.lane.b32.xlu0 %v352_v6, %s2318_s2 }
 0x461   :  { %v355_v15 = vpop.permute.xlu0 %354 }
 0x462   :  { %v357_v17 = vadd.f32 %v355_v15, %v347_v12 }
 0x464   :  { %2040 = vtanh.f32 %v357_v17  ;;  %v433_v46 = vrot.slane %v357_v17, 6 }
 0x465   :  { %2042 = vpow2.f32 %v1870_v19 }
 0x46e   :  { %v2041_v18 = vpop.eup %2040 }
 0x46f   :  { %360 = vrot.lane.b32.xlu1 %v2041_v18, %s2318_s2  ;;  %v2043_v20 = vpop.eup %2042 }
 0x470   :  { %v338_v21 = vadd.f32 1.0, %v2043_v20 }
 0x472   :  { %2044 = vrcp.f32 %v338_v21 }
 0x47c   :  { %v2045_v23 = vpop.eup %2044 }
 0x4e1   :  { %v361_v26 = vpop.permute.xlu1 %360 }
 0x4e2   :  { %v363_v27 = vmul.f32 %v2045_v23, %v361_v26 }
 0x4e4   :  { %v364_v28 = vpack.c.bf16 %v363_v27, %v363_v27  ;;  %v885_v58 = vsel %vm884_vm2, %v2523_v49, %v363_v27 }
 0x4e6   :  { %v366_v29 = vrot.slane %v364_v28, 1 }
 0x4e8   :  { %1871 = vmatmul.mubr.msk.bf16.vlgmr.msra.gmra.mrb[4].mxu1 %vm201_vm1, %v366_v29 }
 0x4e9   :  { %547 = vmatpush1.bf16.msra.mxu1 %v2435_v2  ;;  %578 = vmatprep.mubr.bf16.mxu1 %v2317_v0 }
 0x4ea   :  { %548 = vmatprep.subr.bf16.mxu1 %v2441_v3 }
 0x4ed   :  { %549 = vmatpush1.bf16.msra.mxu1 %v2446_v4 }
 0x4ee   :  { %550 = vmatprep.subr.bf16.mxu1 %v2453_v7 }
 0x4f1   :  { %551 = vmatpush1.bf16.msra.mxu1 %v2462_v9 }
 0x4f2   :  { %552 = vmatprep.subr.bf16.mxu1 %v2467_v10 }
 0x4f5   :  { %553 = vmatpush1.bf16.msra.mxu1 %v2474_v11 }
 0x4f6   :  { %714 = vmatprep.subr.bf16.mxu1 %v2430_v1 }
 0x5bb   :  { %v404_v30 = vpop.f32.mrb[4].mxu1 }
 0x5bc   :  { %v406_v31 = vpop.f32.mrb[5].mxu1  ;;  %v413_v38 = vrot.slane %v404_v30, 4 }
 0x5bd   :  { %v414_v33 = vrot.slane %v406_v31, 4  ;;  %v408_v34 = vpop.f32.mrb[6].mxu1 }
 0x5be   :  { %v409_v35 = vpop.f32.mrb[7].mxu1  ;;  %v417_v39 = vadd.f32 %v413_v38, %v2518_v32 }
 0x5bf   :  { %v418_v36 = vadd.f32 %v414_v33, %v2514_v25 }
 0x5c0   :  { %v1872_v40 = vmul.f32 -1.442695, %v417_v39 }
 0x5c1   :  { %2046 = vtanh.f32 %v418_v36  ;;  %v1873_v52 = vmul.f32 -1.442695, %v418_v36 }
 0x5c2   :  { %2048 = vpow2.f32 %v1872_v40 }
 0x5cb   :  { %v2047_v37 = vpop.eup %2046 }
 0x5cc   :  { %437 = vrot.lane.b32.xlu0 %v2047_v37, %s2318_s2  ;;  %v2049_v41 = vpop.eup %2048 }
 0x5cd   :  { %v425_v42 = vadd.f32 1.0, %v2049_v41 }
 0x5cf   :  { %2050 = vrcp.f32 %v425_v42 }
 0x5d9   :  { %v2051_v43 = vpop.eup %2050 }
 0x5da   :  { %v435_v47 = vmul.f32 %v2051_v43, %v433_v46 }
 0x63e   :  { %v438_v44 = vpop.permute.xlu0 %437 }
 0x63f   :  { %v440_v45 = vmul.f32 %v2051_v43, %v438_v44 }
 0x641   :  { %442 = vrot.lane.b32.xlu1 %v440_v45, %s2318_s2 }
 0x6b3   :  { %v443_v48 = vpop.permute.xlu1 %442 }
 0x6b4   :  { %v445_v50 = vadd.f32 %v443_v48, %v435_v47 }
 0x6b6   :  { %2052 = vtanh.f32 %v445_v50  ;;  %v521_v26 = vrot.slane %v445_v50, 6 }
 0x6b7   :  { %2054 = vpow2.f32 %v1873_v52 }
 0x6c0   :  { %v2053_v51 = vpop.eup %2052 }
 0x6c1   :  { %448 = vrot.lane.b32.xlu0 %v2053_v51, %s2318_s2  ;;  %v2055_v53 = vpop.eup %2054 }
 0x6c2   :  { %v426_v54 = vadd.f32 1.0, %v2055_v53 }
 0x6c4   :  { %2056 = vrcp.f32 %v426_v54 }
 0x6ce   :  { %v2057_v55 = vpop.eup %2056 }
 0x733   :  { %v449_v56 = vpop.permute.xlu0 %448 }
 0x734   :  { %v451_v57 = vmul.f32 %v2057_v55, %v449_v56 }
 0x736   :  { %v452_v59 = vpack.c.bf16 %v451_v57, %v451_v57  ;;  %v887_v60 = vsel %vm886_vm3, %v885_v58, %v451_v57 }
 0x738   :  { %v454_v61 = vrot.slane %v452_v59, 2 }
 0x73a   :  { %1874 = vmatmul.mubr.msk.bf16.vlgmr.msra.gmra.mrb[8].mxu0 %vm201_vm1, %v454_v61 }
 0x73b   :  { %627 = vmatpush1.bf16.msra.mxu0 %v2435_v2  ;;  %658 = vmatprep.mubr.bf16.mxu0 %v2317_v0 }
 0x73c   :  { %628 = vmatprep.subr.bf16.mxu0 %v2441_v3 }
 0x73f   :  { %629 = vmatpush1.bf16.msra.mxu0 %v2446_v4 }
 0x740   :  { %630 = vmatprep.subr.bf16.mxu0 %v2453_v7 }
 0x743   :  { %631 = vmatpush1.bf16.msra.mxu0 %v2462_v9 }
 0x744   :  { %632 = vmatprep.subr.bf16.mxu0 %v2467_v10 }
 0x747   :  { %633 = vmatpush1.bf16.msra.mxu0 %v2474_v11 }
 0x748   :  { %802 = vmatprep.subr.bf16.mxu0 %v2430_v1 }
 0x80d   :  { %v492_v49 = vpop.f32.mrb[8].mxu0 }
 0x80e   :  { %v494_v62 = vpop.f32.mrb[9].mxu0  ;;  %v501_v15 = vrot.slane %v492_v49, 2 }
 0x80f   :  { %v502_v63 = vrot.slane %v494_v62, 2  ;;  %v496_v5 = vpop.f32.mrb[10].mxu0 }
 0x810   :  { %v497_v6 = vpop.f32.mrb[11].mxu0  ;;  %v505_v17 = vadd.f32 %v501_v15, %v2518_v32 }
 0x811   :  { %v506_v8 = vadd.f32 %v502_v63, %v2514_v25 }
 0x812   :  { %v1875_v18 = vmul.f32 -1.442695, %v505_v17 }
 0x813   :  { %2058 = vtanh.f32 %v506_v8  ;;  %v1876_v30 = vmul.f32 -1.442695, %v506_v8 }
 0x814   :  { %2060 = vpow2.f32 %v1875_v18 }
 0x81d   :  { %v2059_v12 = vpop.eup %2058 }
 0x81e   :  { %525 = vrot.lane.b32.xlu1 %v2059_v12, %s2318_s2  ;;  %v2061_v19 = vpop.eup %2060 }
 0x81f   :  { %v513_v20 = vadd.f32 1.0, %v2061_v19 }
 0x821   :  { %2062 = vrcp.f32 %v513_v20 }
 0x82b   :  { %v2063_v1 = vpop.eup %2062 }
 0x82c   :  { %v523_v27 = vmul.f32 %v2063_v1, %v521_v26 }
 0x890   :  { %v526_v21 = vpop.permute.xlu1 %525 }
 0x891   :  { %v528_v23 = vmul.f32 %v2063_v1, %v526_v21 }
 0x893   :  { %530 = vrot.lane.b32.xlu0 %v528_v23, %s2318_s2 }
 0x905   :  { %v531_v25 = vpop.permute.xlu0 %530 }
 0x906   :  { %v533_v28 = vadd.f32 %v531_v25, %v523_v27 }
 0x908   :  { %2064 = vtanh.f32 %v533_v28  ;;  %v603_v53 = vrot.slane %v533_v28, 6 }
 0x909   :  { %2066 = vpow2.f32 %v1876_v30 }
 0x912   :  { %v2065_v29 = vpop.eup %2064 }
 0x913   :  { %536 = vrot.lane.b32.xlu1 %v2065_v29, %s2318_s2  ;;  %v2067_v32 = vpop.eup %2066 }
 0x914   :  { %v514_v31 = vadd.f32 1.0, %v2067_v32 }
 0x916   :  { %2068 = vrcp.f32 %v514_v31 }
 0x920   :  { %v2069_v33 = vpop.eup %2068 }
 0x985   :  { %v537_v34 = vpop.permute.xlu1 %536 }
 0x986   :  { %v539_v35 = vmul.f32 %v2069_v33, %v537_v34 }
 0x988   :  { %v540_v36 = vpack.c.bf16 %v539_v35, %v539_v35  ;;  %v2576_v37 = vsel %vm888_vm4, %v887_v60, %v539_v35 }
 0x98a   :  { %v542_v38 = vrot.slane %v540_v36, 3 }
 0x98c   :  { %1877 = vmatmul.mubr.msk.bf16.vlgmr.msra.gmra.mrb[8].mxu1 %vm201_vm1, %v542_v38 }
 0x98d   :  { %715 = vmatpush1.bf16.msra.mxu1 %v2435_v2  ;;  %746 = vmatprep.mubr.bf16.mxu1 %v2317_v0 }
 0x98e   :  { %716 = vmatprep.subr.bf16.mxu1 %v2441_v3 }
 0x991   :  { %717 = vmatpush1.bf16.msra.mxu1 %v2446_v4 }
 0x992   :  { %718 = vmatprep.subr.bf16.mxu1 %v2453_v7 }
 0x995   :  { %719 = vmatpush1.bf16.msra.mxu1 %v2462_v9 }
 0x996   :  { %720 = vmatprep.subr.bf16.mxu1 %v2467_v10 }
 0x999   :  { %721 = vmatpush1.bf16.msra.mxu1 %v2474_v11 }
 0xa5f   :  { %v580_v39 = vpop.f32.mrb[8].mxu1 }
 0xa60   :  { %v582_v40 = vpop.f32.mrb[9].mxu1  ;;  %v587_v45 = vadd.f32 %v580_v39, %v2510_v22 }
 0xa61   :  { %v588_v41 = vadd.f32 %v582_v40, %v2512_v24  ;;  %v584_v42 = vpop.f32.mrb[10].mxu1 }
 0xa62   :  { %v585_v43 = vpop.f32.mrb[11].mxu1  ;;  %v1878_v46 = vmul.f32 -1.442695, %v587_v45 }
 0xa63   :  { %2070 = vtanh.f32 %v588_v41  ;;  %v1879_v58 = vmul.f32 -1.442695, %v588_v41 }
 0xa64   :  { %2072 = vpow2.f32 %v1878_v46 }
 0xa6d   :  { %v2071_v44 = vpop.eup %2070 }
 0xa6e   :  { %607 = vrot.lane.b32.xlu0 %v2071_v44, %s2318_s2  ;;  %v2073_v47 = vpop.eup %2072 }
 0xa6f   :  { %v595_v48 = vadd.f32 1.0, %v2073_v47 }
 0xa71   :  { %2074 = vrcp.f32 %v595_v48 }
 0xa7b   :  { %v2075_v50 = vpop.eup %2074 }
 0xa7c   :  { %v605_v54 = vmul.f32 %v2075_v50, %v603_v53 }
 0xae0   :  { %v608_v51 = vpop.permute.xlu0 %607 }
 0xae1   :  { %v610_v52 = vmul.f32 %v2075_v50, %v608_v51 }
 0xae3   :  { %612 = vrot.lane.b32.xlu1 %v610_v52, %s2318_s2 }
 0xb55   :  { %v613_v55 = vpop.permute.xlu1 %612 }
 0xb56   :  { %v615_v56 = vadd.f32 %v613_v55, %v605_v54 }
 0xb58   :  { %2076 = vtanh.f32 %v615_v56  ;;  %v689_v20 = vrot.slane %v615_v56, 6 }
 0xb59   :  { %2078 = vpow2.f32 %v1879_v58 }
 0xb62   :  { %v2077_v57 = vpop.eup %2076 }
 0xb63   :  { %618 = vrot.lane.b32.xlu0 %v2077_v57, %s2318_s2  ;;  %v2079_v59 = vpop.eup %2078 }
 0xb64   :  { %v596_v60 = vadd.f32 1.0, %v2079_v59 }
 0xb66   :  { %2080 = vrcp.f32 %v596_v60 }
 0xb70   :  { %v2081_v61 = vpop.eup %2080 }
 0xbd5   :  { %v619_v49 = vpop.permute.xlu0 %618 }
 0xbd6   :  { %v2592_v62 = vmul.f32 %v2081_v61, %v619_v49 }
 0xbd8   :  { %v622_v63 = vpack.c.bf16 %v2592_v62, %v2592_v62 }
 0xbda   :  { %1880 = vmatmul.mubr.msk.bf16.vlgmr.msra.gmra.mrb[12].mxu0 %vm201_vm1, %v622_v63 }
 0xbdb   :  { %803 = vmatpush1.bf16.msra.mxu0 %v2435_v2  ;;  %834 = vmatprep.mubr.bf16.mxu0 %v2317_v0 }
 0xbdc   :  { %804 = vmatprep.subr.bf16.mxu0 %v2441_v3 }
 0xbdf   :  { %805 = vmatpush1.bf16.msra.mxu0 %v2446_v4 }
 0xbe0   :  { %806 = vmatprep.subr.bf16.mxu0 %v2453_v7 }
 0xbe3   :  { %807 = vmatpush1.bf16.msra.mxu0 %v2462_v9 }
 0xbe4   :  { %808 = vmatprep.subr.bf16.mxu0 %v2467_v10 }
 0xbe7   :  { %809 = vmatpush1.bf16.msra.mxu0 %v2474_v11 }
 0xcad   :  { %v660_v5 = vpop.f32.mrb[12].mxu0 }
 0xcae   :  { %v662_v6 = vpop.f32.mrb[13].mxu0  ;;  %v669_v3 = vrot.slane %v660_v5, 6 }
 0xcaf   :  { %v670_v8 = vrot.slane %v662_v6, 6  ;;  %v664_v12 = vpop.f32.mrb[14].mxu0 }
 0xcb0   :  { %v665_v15 = vpop.f32.mrb[15].mxu0  ;;  %v673_v4 = vadd.f32 %v669_v3, %v2510_v22 }
 0xcb1   :  { %v674_v2 = vadd.f32 %v670_v8, %v2512_v24 }
 0xcb2   :  { %v1881_v7 = vmul.f32 -1.442695, %v673_v4 }
 0xcb3   :  { %2082 = vtanh.f32 %v674_v2  ;;  %v1882_v27 = vmul.f32 -1.442695, %v674_v2 }
 0xcb4   :  { %2084 = vpow2.f32 %v1881_v7 }
 0xcbd   :  { %v2083_v17 = vpop.eup %2082 }
 0xcbe   :  { %693 = vrot.lane.b32.xlu1 %v2083_v17, %s2318_s2  ;;  %v2085_v9 = vpop.eup %2084 }
 0xcbf   :  { %v681_v10 = vadd.f32 1.0, %v2085_v9 }
 0xcc1   :  { %2086 = vrcp.f32 %v681_v10 }
 0xccb   :  { %v2087_v11 = vpop.eup %2086 }
 0xccc   :  { %v691_v1 = vmul.f32 %v2087_v11, %v689_v20 }
 0xd30   :  { %v694_v18 = vpop.permute.xlu1 %693 }
 0xd31   :  { %v696_v19 = vmul.f32 %v2087_v11, %v694_v18 }
 0xd33   :  { %698 = vrot.lane.b32.xlu0 %v696_v19, %s2318_s2 }
 0xda5   :  { %v699_v21 = vpop.permute.xlu0 %698 }
 0xda6   :  { %v701_v23 = vadd.f32 %v699_v21, %v691_v1  ;;  %v2000_v1 = vld [vmem:[#allocation5] ss:$8 sps:$4 sm:$0xff]   ;;  %v2002_v21 = vld [vmem:[#allocation5 + $0x4] ss:$8 sps:$4 sm:$0xff]  }
 0xda7   :  { %957 = vmatprep.subr.bf16.mxu1 %v2002_v21 }
 0xda8   :  { %2088 = vtanh.f32 %v701_v23  ;;  %v777_v51 = vrot.slane %v701_v23, 6  ;;  %v2636_v23 = vld [vmem:[#allocation7] ss:$8 sps:$4 sm:$0xff]  }
 0xda9   :  { %2090 = vpow2.f32 %v1882_v27  ;;  %v2006_v27 = vld [vmem:[#allocation5 + $0x10] ss:$8 sps:$4 sm:$0xff]  }
 0xdb2   :  { %v2089_v26 = vpop.eup %2088 }
 0xdb3   :  { %704 = vrot.lane.b32.xlu1 %v2089_v26, %s2318_s2  ;;  %v2091_v25 = vpop.eup %2090  ;;  %v2638_v26 = vld [vmem:[#allocation7 + $0x14] ss:$8 sps:$4 sm:$0xff]  }
 0xdb4   :  { %v682_v28 = vadd.f32 1.0, %v2091_v25  ;;  %v2642_v25 = vld [vmem:[#allocation7 + $0x10] ss:$8 sps:$4 sm:$0xff]  }
 0xdb6   :  { %2092 = vrcp.f32 %v682_v28  ;;  %v2645_v28 = vld [vmem:[#allocation7 + $0x24] ss:$8 sps:$4 sm:$0xff]  }
 0xdc0   :  { %v2093_v29 = vpop.eup %2092 }
 0xe25   :  { %v705_v30 = vpop.permute.xlu1 %704 }
 0xe26   :  { %v707_v32 = vmul.f32 %v2093_v29, %v705_v30  ;;  %v2014_v29 = vld [vmem:[#allocation5 + $0x24] ss:$8 sps:$4 sm:$0xff]   ;;  %v2012_v30 = vld [vmem:[#allocation5 + $0x20] ss:$8 sps:$4 sm:$0xff]  }
 0xe28   :  { %v708_v31 = vpack.c.bf16 %v707_v32, %v707_v32  ;;  %v890_v49 = vsel %vm884_vm2, %v2592_v62, %v707_v32  ;;  %v2648_v32 = vld [vmem:[#allocation7 + $0x20] ss:$8 sps:$4 sm:$0xff]  }
 0xe2a   :  { %v710_v33 = vrot.slane %v708_v31, 1 }
 0xe2c   :  { %1883 = vmatmul.mubr.msk.bf16.vlgmr.msra.gmra.mrb[12].mxu1 %vm201_vm1, %v710_v33 }
 0xe2d   :  { %989 = vmatprep.mubr.bf16.mxu1 %v2317_v0  ;;  %958 = vmatpush1.bf16.msra.mxu1 %v2000_v1 }
 0xeff   :  { %v748_v34 = vpop.f32.mrb[12].mxu1 }
 0xf00   :  { %v750_v35 = vpop.f32.mrb[13].mxu1  ;;  %v757_v42 = vrot.slane %v748_v34, 4  ;;  %v2653_v34 = vld [vmem:[#allocation7 + $0x34] ss:$8 sps:$4 sm:$0xff]  }
 0xf01   :  { %v758_v36 = vrot.slane %v750_v35, 4  ;;  %v752_v38 = vpop.f32.mrb[14].mxu1 }
 0xf02   :  { %v753_v39 = vpop.f32.mrb[15].mxu1  ;;  %v761_v43 = vadd.f32 %v757_v42, %v2510_v22  ;;  %v2655_v38 = vld [vmem:[#allocation7 + $0x30] ss:$8 sps:$4 sm:$0xff]  }
 0xf03   :  { %v762_v40 = vadd.f32 %v758_v36, %v2512_v24  ;;  %v2020_v36 = vld [vmem:[#allocation5 + $0x34] ss:$8 sps:$4 sm:$0xff]  }
 0xf04   :  { %v1884_v44 = vmul.f32 -1.442695, %v761_v43 }
 0xf05   :  { %2094 = vtanh.f32 %v762_v40  ;;  %v1885_v56 = vmul.f32 -1.442695, %v762_v40  ;;  %v2018_v40 = vld [vmem:[#allocation5 + $0x30] ss:$8 sps:$4 sm:$0xff]  }
 0xf06   :  { %2096 = vpow2.f32 %v1884_v44 }
 0xf0f   :  { %v2095_v41 = vpop.eup %2094 }
 0xf10   :  { %781 = vrot.lane.b32.xlu0 %v2095_v41, %s2318_s2  ;;  %v2097_v45 = vpop.eup %2096 }
 0xf11   :  { %v769_v46 = vadd.f32 1.0, %v2097_v45 }
 0xf13   :  { %2098 = vrcp.f32 %v769_v46 }
 0xf1d   :  { %v2099_v47 = vpop.eup %2098 }
 0xf1e   :  { %v779_v52 = vmul.f32 %v2099_v47, %v777_v51 }
 0xf82   :  { %v782_v48 = vpop.permute.xlu0 %781 }
 0xf83   :  { %v784_v50 = vmul.f32 %v2099_v47, %v782_v48 }
 0xf85   :  { %786 = vrot.lane.b32.xlu1 %v784_v50, %s2318_s2 }
 0xff7   :  { %v787_v53 = vpop.permute.xlu1 %786 }
 0xff8   :  { %v2616_v54 = vadd.f32 %v787_v53, %v779_v52 }
 0xffa   :  { %2100 = vtanh.f32 %v2616_v54  ;;  %v865_v31 = vrot.slane %v2616_v54, 6  ;;  %v902_v54 = vld [vmem:[%s2837_s6] sm:$0x3] }
 0xffb   :  { %2102 = vpow2.f32 %v1885_v56 }
0x1004   :  { %v2101_v55 = vpop.eup %2100 }
0x1005   :  { %792 = vrot.lane.b32.xlu0 %v2101_v55, %s2318_s2  ;;  %v2103_v57 = vpop.eup %2102  ;;  %v911_v55 = vrot.slane %v902_v54, %v87_v16 }
0x1006   :  { %v770_v58 = vadd.f32 1.0, %v2103_v57  ;;  %v907_v57 = vrot.slane %v902_v54, %v83_v14 }
0x1008   :  { %2104 = vrcp.f32 %v770_v58 }
0x1012   :  { %v2105_v59 = vpop.eup %2104 }
0x1077   :  { %v793_v60 = vpop.permute.xlu0 %792 }
0x1078   :  { %v795_v61 = vmul.f32 %v2105_v59, %v793_v60 }
0x107a   :  { %v796_v63 = vpack.c.bf16 %v795_v61, %v795_v61  ;;  %v2623_v5 = vsel %vm886_vm3, %v890_v49, %v795_v61 }
0x107c   :  { %v798_v6 = vrot.slane %v796_v63, 2 }
0x107e   :  { %1886 = vmatmul.mubr.msk.bf16.vlgmr.msra.gmra.mrb[16].mxu0 %vm201_vm1, %v798_v6 }
0x107f   :  { %1080 = vmatprep.mubr.bf16.mxu0 %v2317_v0 }
0x1151   :  { %v836_v8 = vpop.f32.mrb[16].mxu0 }
0x1152   :  { %v838_v12 = vpop.f32.mrb[17].mxu0  ;;  %v845_v4 = vrot.slane %v836_v8, 2 }
0x1153   :  { %v846_v15 = vrot.slane %v838_v12, 2  ;;  %v840_v2 = vpop.f32.mrb[18].mxu0 }
0x1154   :  { %v841_v17 = vpop.f32.mrb[19].mxu0  ;;  %v849_v7 = vadd.f32 %v845_v4, %v2510_v22  ;;  %v2008_v22 = vld [vmem:[#allocation5 + $0x14] ss:$8 sps:$4 sm:$0xff]  }
0x1155   :  { %v2628_v3 = vadd.f32 %v846_v15, %v2512_v24  ;;  %v2634_v24 = vld [vmem:[#allocation7 + $0x4] ss:$8 sps:$4 sm:$0xff]   ;;  %959 = vmatprep.subr.bf16.mxu1 %v2008_v22 }
0x1156   :  { %v1887_v9 = vmul.f32 -1.442695, %v849_v7  ;;  %1048 = vmatprep.subr.bf16.mxu0 %v2634_v24  ;;  %960 = vmatpush1.bf16.msra.mxu1 %v2006_v27 }
0x1157   :  { %2106 = vtanh.f32 %v2628_v3  ;;  %1049 = vmatpush1.bf16.msra.mxu0 %v2636_v23  ;;  %961 = vmatprep.subr.bf16.mxu1 %v2014_v29  ;;  %v1888_v42 = vmul.f32 -1.442695, %v2628_v3 }
0x1158   :  { %2108 = vpow2.f32 %v1887_v9  ;;  %1050 = vmatprep.subr.bf16.mxu0 %v2638_v26 }
0x115a   :  { %962 = vmatpush1.bf16.msra.mxu1 %v2012_v30 }
0x115b   :  { %1051 = vmatpush1.bf16.msra.mxu0 %v2642_v25  ;;  %963 = vmatprep.subr.bf16.mxu1 %v2020_v36 }
0x115c   :  { %1052 = vmatprep.subr.bf16.mxu0 %v2645_v28 }
0x115e   :  { %964 = vmatpush1.bf16.msra.mxu1 %v2018_v40 }
0x115f   :  { %1053 = vmatpush1.bf16.msra.mxu0 %v2648_v32  ;;  %1125 = vmatprep.subr.bf16.mxu1 %v2634_v24 }
0x1160   :  { %1054 = vmatprep.subr.bf16.mxu0 %v2653_v34 }
0x1161   :  { %v2107_v62 = vpop.eup %2106 }
0x1162   :  { %869 = vrot.lane.b32.xlu1 %v2107_v62, %s2318_s2  ;;  %v2109_v10 = vpop.eup %2108 }
0x1163   :  { %v857_v11 = vadd.f32 1.0, %v2109_v10  ;;  %1055 = vmatpush1.bf16.msra.mxu0 %v2655_v38 }
0x1164   :  { %1213 = vmatprep.subr.bf16.mxu0 %v2634_v24 }
0x1165   :  { %2110 = vrcp.f32 %v857_v11 }
0x1166   :  { %1081 = vmatmul.mubr.bf16.vlgmr.msra.gmra.mrb[20].mxu0 %v2317_v0 }
0x1167   :  { %1214 = vmatpush1.bf16.msra.mxu0 %v2636_v23  ;;  %1245 = vmatprep.mubr.bf16.mxu0 %v2317_v0 }
0x1168   :  { %1215 = vmatprep.subr.bf16.mxu0 %v2638_v26 }
0x116b   :  { %1216 = vmatpush1.bf16.msra.mxu0 %v2642_v25 }
0x116c   :  { %1217 = vmatprep.subr.bf16.mxu0 %v2645_v28 }
0x116f   :  { %v2111_v18 = vpop.eup %2110  ;;  %1218 = vmatpush1.bf16.msra.mxu0 %v2648_v32 }
0x1170   :  { %v867_v33 = vmul.f32 %v2111_v18, %v865_v31  ;;  %1219 = vmatprep.subr.bf16.mxu0 %v2653_v34 }
0x1173   :  { %1220 = vmatpush1.bf16.msra.mxu0 %v2655_v38 }
0x1174   :  { %1389 = vmatprep.subr.bf16.mxu0 %v2634_v24 }
0x11d4   :  { %v870_v19 = vpop.permute.xlu1 %869 }
0x11d5   :  { %v872_v20 = vmul.f32 %v2111_v18, %v870_v19 }
0x11d7   :  { %874 = vrot.lane.b32.xlu0 %v872_v20, %s2318_s2 }
0x1249   :  { %v875_v35 = vpop.permute.xlu0 %874 }
0x124a   :  { %v877_v39 = vadd.f32 %v875_v35, %v867_v33 }
0x124c   :  { %2112 = vtanh.f32 %v877_v39 }
0x124d   :  { %2114 = vpow2.f32 %v1888_v42 }
0x1256   :  { %v2113_v41 = vpop.eup %2112 }
0x1257   :  { %880 = vrot.lane.b32.xlu1 %v2113_v41, %s2318_s2  ;;  %v2115_v43 = vpop.eup %2114 }
0x1258   :  { %v858_v44 = vadd.f32 1.0, %v2115_v43 }
0x125a   :  { %2116 = vrcp.f32 %v858_v44 }
0x1264   :  { %v2117_v45 = vpop.eup %2116 }
0x12c9   :  { %v881_v46 = vpop.permute.xlu1 %880 }
0x12ca   :  { %v883_v47 = vmul.f32 %v2117_v45, %v881_v46 }
0x12cc   :  { %v892_v48 = vsel %vm888_vm4, %v2623_v5, %v883_v47 }
0x12cd   :  { %v893_v50 = vpack.c.bf16 %v892_v48, %v2576_v37  ;;  %v1082_v37 = vpop.f32.mrb[20].mxu0 }
0x12ce   :  { %v1084_v51 = vpop.f32.mrb[21].mxu0 }
0x12cf   :  { %1897 = vmatmul.mubr.msk.bf16.vlgmr.msra.gmra.mrb[16].mxu1 %vm201_vm1, %v893_v50  ;;  %v1086_v52 = vpop.f32.mrb[22].mxu0 }
0x12d0   :  { %1126 = vmatpush1.bf16.msra.mxu1 %v2636_v23  ;;  %1157 = vmatprep.mubr.bf16.mxu1 %v2317_v0  ;;  %v1087_v53 = vpop.f32.mrb[23].mxu0 }
0x12d1   :  { %1127 = vmatprep.subr.bf16.mxu1 %v2638_v26 }
0x12d4   :  { %1128 = vmatpush1.bf16.msra.mxu1 %v2642_v25 }
0x12d5   :  { %1129 = vmatprep.subr.bf16.mxu1 %v2645_v28 }
0x12d8   :  { %1130 = vmatpush1.bf16.msra.mxu1 %v2648_v32 }
0x12d9   :  { %1131 = vmatprep.subr.bf16.mxu1 %v2653_v34 }
0x12dc   :  { %1132 = vmatpush1.bf16.msra.mxu1 %v2655_v38 }
0x12dd   :  { %1301 = vmatprep.subr.bf16.mxu1 %v2634_v24 }
0x13a2   :  { %v991_v56 = vpop.f32.mrb[16].mxu1 }
0x13a3   :  { %v993_v58 = vpop.f32.mrb[17].mxu1  ;;  %v2701_v16 = vadd.f32 %v991_v56, %v907_v57 }
0x13a4   :  { %v2693_v59 = vadd.f32 %v993_v58, %v911_v55  ;;  %v995_v60 = vpop.f32.mrb[18].mxu1 }
0x13a5   :  { %v2695_v61 = vadd.f32 %v995_v60, %v907_v57  ;;  %v997_v49 = vpop.f32.mrb[19].mxu1  ;;  %v1089_v13 = vadd.f32 %v1082_v37, %v2701_v16 }
0x13a6   :  { %v1090_v63 = vadd.f32 %v1084_v51, %v2693_v59  ;;  %v2698_v5 = vadd.f32 %v997_v49, %v911_v55 }
0x13a7   :  { %v1906_v14 = vmul.f32 -1.442695, %v1089_v13 }
0x13a8   :  { %2118 = vtanh.f32 %v1090_v63  ;;  %v1907_v9 = vmul.f32 -1.442695, %v1090_v63 }
0x13a9   :  { %2120 = vpow2.f32 %v1906_v14 }
0x13b2   :  { %v2119_v6 = vpop.eup %2118 }
0x13b3   :  { %1106 = vrot.lane.b32.xlu0 %v2119_v6, %s2318_s2  ;;  %v2121_v8 = vpop.eup %2120 }
0x13b4   :  { %v1097_v12 = vadd.f32 1.0, %v2121_v8 }
0x13b6   :  { %2122 = vrcp.f32 %v1097_v12 }
0x13c0   :  { %v2123_v15 = vpop.eup %2122 }
0x13c1   :  { %v1104_v3 = vmul.f32 0.0, %v2123_v15 }
0x1425   :  { %v1107_v2 = vpop.permute.xlu0 %1106 }
0x1426   :  { %v1109_v17 = vmul.f32 %v2123_v15, %v1107_v2 }
0x1428   :  { %1111 = vrot.lane.b32.xlu1 %v1109_v17, %s2318_s2 }
0x149a   :  { %v1112_v62 = vpop.permute.xlu1 %1111 }
0x149b   :  { %v1114_v4 = vadd.f32 %v1112_v62, %v1104_v3 }
0x149d   :  { %2124 = vtanh.f32 %v1114_v4  ;;  %v1188_v45 = vrot.slane %v1114_v4, 6 }
0x149e   :  { %2126 = vpow2.f32 %v1907_v9 }
0x14a7   :  { %v2125_v7 = vpop.eup %2124 }
0x14a8   :  { %1117 = vrot.lane.b32.xlu0 %v2125_v7, %s2318_s2  ;;  %v2127_v10 = vpop.eup %2126 }
0x14a9   :  { %v1098_v11 = vadd.f32 1.0, %v2127_v10 }
0x14ab   :  { %2128 = vrcp.f32 %v1098_v11 }
0x14b5   :  { %v2129_v18 = vpop.eup %2128 }
0x151a   :  { %v1118_v19 = vpop.permute.xlu0 %1117 }
0x151b   :  { %v1120_v20 = vmul.f32 %v2129_v18, %v1118_v19 }
0x151d   :  { %v1121_v1 = vpack.c.bf16 %v1120_v20, %v1120_v20 }
0x151f   :  { %1908 = vmatmul.mubr.msk.bf16.vlgmr.msra.gmra.mrb[20].mxu1 %vm201_vm1, %v1121_v1 }
0x1520   :  { %1302 = vmatpush1.bf16.msra.mxu1 %v2636_v23  ;;  %1333 = vmatprep.mubr.bf16.mxu1 %v2317_v0 }
0x1521   :  { %1303 = vmatprep.subr.bf16.mxu1 %v2638_v26 }
0x1524   :  { %1304 = vmatpush1.bf16.msra.mxu1 %v2642_v25 }
0x1525   :  { %1305 = vmatprep.subr.bf16.mxu1 %v2645_v28 }
0x1528   :  { %1306 = vmatpush1.bf16.msra.mxu1 %v2648_v32 }
0x1529   :  { %1307 = vmatprep.subr.bf16.mxu1 %v2653_v34 }
0x152c   :  { %1308 = vmatpush1.bf16.msra.mxu1 %v2655_v38 }
0x152d   :  { %1469 = vmatprep.subr.bf16.mxu1 %v2634_v24 }
0x15f2   :  { %v1159_v21 = vpop.f32.mrb[20].mxu1 }
0x15f3   :  { %v1161_v22 = vpop.f32.mrb[21].mxu1  ;;  %v1168_v35 = vrot.slane %v1159_v21, 6 }
0x15f4   :  { %v1169_v27 = vrot.slane %v1161_v22, 6  ;;  %v1163_v29 = vpop.f32.mrb[22].mxu1 }
0x15f5   :  { %v1164_v30 = vpop.f32.mrb[23].mxu1  ;;  %v1172_v36 = vadd.f32 %v1168_v35, %v2701_v16 }
0x15f6   :  { %v1173_v31 = vadd.f32 %v1169_v27, %v2693_v59 }
0x15f7   :  { %v1909_v39 = vmul.f32 -1.442695, %v1172_v36 }
0x15f8   :  { %2130 = vtanh.f32 %v1173_v31  ;;  %v1910_v37 = vmul.f32 -1.442695, %v1173_v31 }
0x15f9   :  { %2132 = vpow2.f32 %v1909_v39 }
0x1602   :  { %v2131_v33 = vpop.eup %2130 }
0x1603   :  { %1192 = vrot.lane.b32.xlu1 %v2131_v33, %s2318_s2  ;;  %v2133_v40 = vpop.eup %2132 }
0x1604   :  { %v1180_v41 = vadd.f32 1.0, %v2133_v40 }
0x1606   :  { %2134 = vrcp.f32 %v1180_v41 }
0x1610   :  { %v2135_v42 = vpop.eup %2134 }
0x1611   :  { %v1190_v46 = vmul.f32 %v2135_v42, %v1188_v45 }
0x1675   :  { %v1193_v43 = vpop.permute.xlu1 %1192 }
0x1676   :  { %v1195_v44 = vmul.f32 %v2135_v42, %v1193_v43 }
0x1678   :  { %1197 = vrot.lane.b32.xlu0 %v1195_v44, %s2318_s2 }
0x16ea   :  { %v1198_v47 = vpop.permute.xlu0 %1197 }
0x16eb   :  { %v1200_v48 = vadd.f32 %v1198_v47, %v1190_v46 }
0x16ed   :  { %2136 = vtanh.f32 %v1200_v48  ;;  %v1276_v7 = vrot.slane %v1200_v48, 6 }
0x16ee   :  { %2138 = vpow2.f32 %v1910_v37 }
0x16f7   :  { %v2137_v50 = vpop.eup %2136 }
0x16f8   :  { %1203 = vrot.lane.b32.xlu1 %v2137_v50, %s2318_s2  ;;  %v2139_v51 = vpop.eup %2138 }
0x16f9   :  { %v1181_v52 = vadd.f32 1.0, %v2139_v51 }
0x16fb   :  { %2140 = vrcp.f32 %v1181_v52 }
0x1705   :  { %v2141_v53 = vpop.eup %2140 }
0x176a   :  { %v1204_v54 = vpop.permute.xlu1 %1203 }
0x176b   :  { %v1206_v55 = vmul.f32 %v2141_v53, %v1204_v54 }
0x176d   :  { %v1207_v56 = vpack.c.bf16 %v1206_v55, %v1206_v55 }
0x176f   :  { %v1209_v57 = vrot.slane %v1207_v56, 1 }
0x1771   :  { %1911 = vmatmul.mubr.msk.bf16.vlgmr.msra.gmra.mrb[24].mxu0 %vm201_vm1, %v1209_v57 }
0x1772   :  { %1390 = vmatpush1.bf16.msra.mxu0 %v2636_v23  ;;  %1421 = vmatprep.mubr.bf16.mxu0 %v2317_v0 }
0x1773   :  { %1391 = vmatprep.subr.bf16.mxu0 %v2638_v26 }
0x1776   :  { %1392 = vmatpush1.bf16.msra.mxu0 %v2642_v25 }
0x1777   :  { %1393 = vmatprep.subr.bf16.mxu0 %v2645_v28 }
0x177a   :  { %1394 = vmatpush1.bf16.msra.mxu0 %v2648_v32 }
0x177b   :  { %1395 = vmatprep.subr.bf16.mxu0 %v2653_v34 }
0x177e   :  { %1396 = vmatpush1.bf16.msra.mxu0 %v2655_v38 }
0x177f   :  { %1557 = vmatprep.subr.bf16.mxu0 %v2634_v24 }
0x1844   :  { %v1247_v58 = vpop.f32.mrb[24].mxu0 }
0x1845   :  { %v1249_v60 = vpop.f32.mrb[25].mxu0  ;;  %v1256_v8 = vrot.slane %v1247_v58, 4 }
0x1846   :  { %v1257_v49 = vrot.slane %v1249_v60, 4  ;;  %v1251_v63 = vpop.f32.mrb[26].mxu0 }
0x1847   :  { %v1252_v6 = vpop.f32.mrb[27].mxu0  ;;  %v1260_v12 = vadd.f32 %v1256_v8, %v2701_v16 }
0x1848   :  { %v1261_v13 = vadd.f32 %v1257_v49, %v2693_v59 }
0x1849   :  { %v1912_v15 = vmul.f32 -1.442695, %v1260_v12 }
0x184a   :  { %2142 = vtanh.f32 %v1261_v13  ;;  %v1913_v19 = vmul.f32 -1.442695, %v1261_v13 }
0x184b   :  { %2144 = vpow2.f32 %v1912_v15 }
0x1854   :  { %v2143_v14 = vpop.eup %2142 }
0x1855   :  { %1280 = vrot.lane.b32.xlu0 %v2143_v14, %s2318_s2  ;;  %v2145_v2 = vpop.eup %2144 }
0x1856   :  { %v1268_v17 = vadd.f32 1.0, %v2145_v2 }
0x1858   :  { %2146 = vrcp.f32 %v1268_v17 }
0x1862   :  { %v2147_v3 = vpop.eup %2146 }
0x1863   :  { %v1278_v9 = vmul.f32 %v2147_v3, %v1276_v7 }
0x18c7   :  { %v1281_v62 = vpop.permute.xlu0 %1280 }
0x18c8   :  { %v1283_v4 = vmul.f32 %v2147_v3, %v1281_v62 }
0x18ca   :  { %1285 = vrot.lane.b32.xlu1 %v1283_v4, %s2318_s2 }
0x193c   :  { %v1286_v10 = vpop.permute.xlu1 %1285 }
0x193d   :  { %v1288_v11 = vadd.f32 %v1286_v10, %v1278_v9 }
0x193f   :  { %2148 = vtanh.f32 %v1288_v11  ;;  %v1364_v50 = vrot.slane %v1288_v11, 6 }
0x1940   :  { %2150 = vpow2.f32 %v1913_v19 }
0x1949   :  { %v2149_v18 = vpop.eup %2148 }
0x194a   :  { %1291 = vrot.lane.b32.xlu0 %v2149_v18, %s2318_s2  ;;  %v2151_v20 = vpop.eup %2150 }
0x194b   :  { %v1269_v1 = vadd.f32 1.0, %v2151_v20 }
0x194d   :  { %2152 = vrcp.f32 %v1269_v1 }
0x1957   :  { %v2153_v21 = vpop.eup %2152 }
0x19bc   :  { %v1292_v22 = vpop.permute.xlu0 %1291 }
0x19bd   :  { %v1294_v27 = vmul.f32 %v2153_v21, %v1292_v22 }
0x19bf   :  { %v1295_v29 = vpack.c.bf16 %v1294_v27, %v1294_v27 }
0x19c1   :  { %v1297_v30 = vrot.slane %v1295_v29, 2 }
0x19c3   :  { %1914 = vmatmul.mubr.msk.bf16.vlgmr.msra.gmra.mrb[24].mxu1 %vm201_vm1, %v1297_v30 }
0x19c4   :  { %1470 = vmatpush1.bf16.msra.mxu1 %v2636_v23  ;;  %1501 = vmatprep.mubr.bf16.mxu1 %v2317_v0 }
0x19c5   :  { %1471 = vmatprep.subr.bf16.mxu1 %v2638_v26 }
0x19c8   :  { %1472 = vmatpush1.bf16.msra.mxu1 %v2642_v25 }
0x19c9   :  { %1473 = vmatprep.subr.bf16.mxu1 %v2645_v28 }
0x19cc   :  { %1474 = vmatpush1.bf16.msra.mxu1 %v2648_v32 }
0x19cd   :  { %1475 = vmatprep.subr.bf16.mxu1 %v2653_v34 }
0x19d0   :  { %1476 = vmatpush1.bf16.msra.mxu1 %v2655_v38 }
0x19d1   :  { %1645 = vmatprep.subr.bf16.mxu1 %v2634_v24 }
0x1a96   :  { %v1335_v31 = vpop.f32.mrb[24].mxu1 }
0x1a97   :  { %v1337_v33 = vpop.f32.mrb[25].mxu1  ;;  %v1344_v42 = vrot.slane %v1335_v31, 2 }
0x1a98   :  { %v1345_v35 = vrot.slane %v1337_v33, 2  ;;  %v1339_v36 = vpop.f32.mrb[26].mxu1 }
0x1a99   :  { %v1340_v39 = vpop.f32.mrb[27].mxu1  ;;  %v1348_v43 = vadd.f32 %v1344_v42, %v2701_v16 }
0x1a9a   :  { %v1349_v40 = vadd.f32 %v1345_v35, %v2693_v59 }
0x1a9b   :  { %v1915_v44 = vmul.f32 -1.442695, %v1348_v43 }
0x1a9c   :  { %2154 = vtanh.f32 %v1349_v40  ;;  %v1916_v53 = vmul.f32 -1.442695, %v1349_v40 }
0x1a9d   :  { %2156 = vpow2.f32 %v1915_v44 }
0x1aa6   :  { %v2155_v41 = vpop.eup %2154 }
0x1aa7   :  { %1368 = vrot.lane.b32.xlu1 %v2155_v41, %s2318_s2  ;;  %v2157_v45 = vpop.eup %2156 }
0x1aa8   :  { %v1356_v46 = vadd.f32 1.0, %v2157_v45 }
0x1aaa   :  { %2158 = vrcp.f32 %v1356_v46 }
0x1ab4   :  { %v2159_v24 = vpop.eup %2158 }
0x1ab5   :  { %v1366_v37 = vmul.f32 %v2159_v24, %v1364_v50 }
0x1b19   :  { %v1369_v47 = vpop.permute.xlu1 %1368 }
0x1b1a   :  { %v1371_v48 = vmul.f32 %v2159_v24, %v1369_v47 }
0x1b1c   :  { %1373 = vrot.lane.b32.xlu0 %v1371_v48, %s2318_s2 }
0x1b8e   :  { %v1374_v59 = vpop.permute.xlu0 %1373 }
0x1b8f   :  { %v1376_v51 = vadd.f32 %v1374_v59, %v1366_v37 }
0x1b91   :  { %2160 = vtanh.f32 %v1376_v51  ;;  %v1446_v7 = vrot.slane %v1376_v51, 6 }
0x1b92   :  { %2162 = vpow2.f32 %v1916_v53 }
0x1b9b   :  { %v2161_v52 = vpop.eup %2160 }
0x1b9c   :  { %1379 = vrot.lane.b32.xlu1 %v2161_v52, %s2318_s2  ;;  %v2163_v16 = vpop.eup %2162 }
0x1b9d   :  { %v1357_v54 = vadd.f32 1.0, %v2163_v16 }
0x1b9f   :  { %2164 = vrcp.f32 %v1357_v54 }
0x1ba9   :  { %v2165_v55 = vpop.eup %2164 }
0x1c0e   :  { %v1380_v56 = vpop.permute.xlu1 %1379 }
0x1c0f   :  { %v1382_v57 = vmul.f32 %v2165_v55, %v1380_v56 }
0x1c11   :  { %v1383_v58 = vpack.c.bf16 %v1382_v57, %v1382_v57 }
0x1c13   :  { %v1385_v60 = vrot.slane %v1383_v58, 3 }
0x1c15   :  { %1917 = vmatmul.mubr.msk.bf16.vlgmr.msra.gmra.mrb[28].mxu0 %vm201_vm1, %v1385_v60 }
0x1c16   :  { %1558 = vmatpush1.bf16.msra.mxu0 %v2636_v23  ;;  %1589 = vmatprep.mubr.bf16.mxu0 %v2317_v0 }
0x1c17   :  { %1559 = vmatprep.subr.bf16.mxu0 %v2638_v26 }
0x1c1a   :  { %1560 = vmatpush1.bf16.msra.mxu0 %v2642_v25 }
0x1c1b   :  { %1561 = vmatprep.subr.bf16.mxu0 %v2645_v28 }
0x1c1e   :  { %1562 = vmatpush1.bf16.msra.mxu0 %v2648_v32 }
0x1c1f   :  { %1563 = vmatprep.subr.bf16.mxu0 %v2653_v34 }
0x1c22   :  { %1564 = vmatpush1.bf16.msra.mxu0 %v2655_v38 }
0x1ce8   :  { %v1423_v49 = vpop.f32.mrb[28].mxu0 }
0x1ce9   :  { %v1425_v63 = vpop.f32.mrb[29].mxu0  ;;  %v1430_v12 = vadd.f32 %v1423_v49, %v2695_v61 }
0x1cea   :  { %v1431_v6 = vadd.f32 %v1425_v63, %v2698_v5  ;;  %v1427_v13 = vpop.f32.mrb[30].mxu0 }
0x1ceb   :  { %v1428_v14 = vpop.f32.mrb[31].mxu0  ;;  %v1918_v15 = vmul.f32 -1.442695, %v1430_v12 }
0x1cec   :  { %2166 = vtanh.f32 %v1431_v6  ;;  %v1919_v19 = vmul.f32 -1.442695, %v1431_v6 }
0x1ced   :  { %2168 = vpow2.f32 %v1918_v15 }
0x1cf6   :  { %v2167_v8 = vpop.eup %2166 }
0x1cf7   :  { %1450 = vrot.lane.b32.xlu0 %v2167_v8, %s2318_s2  ;;  %v2169_v2 = vpop.eup %2168 }
0x1cf8   :  { %v1438_v17 = vadd.f32 1.0, %v2169_v2 }
0x1cfa   :  { %2170 = vrcp.f32 %v1438_v17 }
0x1d04   :  { %v2171_v3 = vpop.eup %2170 }
0x1d05   :  { %v1448_v9 = vmul.f32 %v2171_v3, %v1446_v7 }
0x1d69   :  { %v1451_v62 = vpop.permute.xlu0 %1450 }
0x1d6a   :  { %v1453_v4 = vmul.f32 %v2171_v3, %v1451_v62 }
0x1d6c   :  { %1455 = vrot.lane.b32.xlu1 %v1453_v4, %s2318_s2 }
0x1dde   :  { %v1456_v10 = vpop.permute.xlu1 %1455 }
0x1ddf   :  { %v1458_v11 = vadd.f32 %v1456_v10, %v1448_v9 }
0x1de1   :  { %2172 = vtanh.f32 %v1458_v11  ;;  %v1532_v41 = vrot.slane %v1458_v11, 6 }
0x1de2   :  { %2174 = vpow2.f32 %v1919_v19 }
0x1deb   :  { %v2173_v18 = vpop.eup %2172 }
0x1dec   :  { %1461 = vrot.lane.b32.xlu0 %v2173_v18, %s2318_s2  ;;  %v2175_v20 = vpop.eup %2174 }
0x1ded   :  { %v1439_v1 = vadd.f32 1.0, %v2175_v20 }
0x1def   :  { %2176 = vrcp.f32 %v1439_v1 }
0x1df9   :  { %v2177_v21 = vpop.eup %2176 }
0x1e5e   :  { %v1462_v22 = vpop.permute.xlu0 %1461 }
0x1e5f   :  { %v1464_v27 = vmul.f32 %v2177_v21, %v1462_v22 }
0x1e61   :  { %v1465_v29 = vpack.c.bf16 %v1464_v27, %v1464_v27 }
0x1e63   :  { %1920 = vmatmul.mubr.msk.bf16.vlgmr.msra.gmra.mrb[28].mxu1 %vm201_vm1, %v1465_v29 }
0x1e64   :  { %1646 = vmatpush1.bf16.msra.mxu1 %v2636_v23  ;;  %1677 = vmatprep.mubr.bf16.mxu1 %v2317_v0 }
0x1e65   :  { %1647 = vmatprep.subr.bf16.mxu1 %v2638_v26 }
0x1e68   :  { %1648 = vmatpush1.bf16.msra.mxu1 %v2642_v25 }
0x1e69   :  { %1649 = vmatprep.subr.bf16.mxu1 %v2645_v28 }
0x1e6c   :  { %1650 = vmatpush1.bf16.msra.mxu1 %v2648_v32 }
0x1e6d   :  { %1651 = vmatprep.subr.bf16.mxu1 %v2653_v34 }
0x1e70   :  { %1652 = vmatpush1.bf16.msra.mxu1 %v2655_v38 }
0x1f36   :  { %v1503_v30 = vpop.f32.mrb[28].mxu1 }
0x1f37   :  { %v1505_v31 = vpop.f32.mrb[29].mxu1  ;;  %v1512_v26 = vrot.slane %v1503_v30, 6 }
0x1f38   :  { %v1513_v33 = vrot.slane %v1505_v31, 6  ;;  %v1507_v35 = vpop.f32.mrb[30].mxu1 }
0x1f39   :  { %v1508_v36 = vpop.f32.mrb[31].mxu1  ;;  %v1516_v25 = vadd.f32 %v1512_v26, %v2695_v61 }
0x1f3a   :  { %v1517_v23 = vadd.f32 %v1513_v33, %v2698_v5 }
0x1f3b   :  { %v1921_v28 = vmul.f32 -1.442695, %v1516_v25 }
0x1f3c   :  { %2178 = vtanh.f32 %v1517_v23  ;;  %v1922_v46 = vmul.f32 -1.442695, %v1517_v23 }
0x1f3d   :  { %2180 = vpow2.f32 %v1921_v28  ;;  %v1728_v28 = vld [vmem:[%s2838_s7 + $0x8] sm:$0xff] }
0x1f46   :  { %v2179_v0 = vpop.eup %2178 }
0x1f47   :  { %1536 = vrot.lane.b32.xlu1 %v2179_v0, %s2318_s2  ;;  %v2181_v32 = vpop.eup %2180 }
0x1f48   :  { %v1524_v34 = vadd.f32 1.0, %v2181_v32  ;;  %v2319_v32 = vmov 0.0|0.0  }
0x1f49   :  { %1959 = vmatprep.subr.bf16.mxu0 %v2319_v32 }
0x1f4a   :  { %2182 = vrcp.f32 %v1524_v34 }
0x1f54   :  { %v2183_v38 = vpop.eup %2182 }
0x1f55   :  { %v1534_v42 = vmul.f32 %v2183_v38, %v1532_v41  ;;  %v1732_v41 = vld [vmem:[%s2838_s7 + $0x28] sm:$0xff] }
0x1fb9   :  { %v1537_v39 = vpop.permute.xlu1 %1536 }
0x1fba   :  { %v1539_v40 = vmul.f32 %v2183_v38, %v1537_v39  ;;  %v1730_v38 = vld [vmem:[%s2838_s7 + $0x18] sm:$0xff] }
0x1fbc   :  { %1541 = vrot.lane.b32.xlu0 %v1539_v40, %s2318_s2  ;;  %v1731_v40 = vld [vmem:[%s2838_s7 + $0x20] sm:$0xff] }
0x202e   :  { %v1542_v43 = vpop.permute.xlu0 %1541 }
0x202f   :  { %v1544_v44 = vadd.f32 %v1542_v43, %v1534_v42  ;;  %v1966_v42 = vpack.c.bf16 %v1732_v41, %v1731_v40 }
0x2031   :  { %2184 = vtanh.f32 %v1544_v44  ;;  %v1620_v12 = vrot.slane %v1544_v44, 6 }
0x2032   :  { %2186 = vpow2.f32 %v1922_v46  ;;  %v1734_v46 = vld [vmem:[%s2838_s7 + $0x38] sm:$0xff] }
0x203b   :  { %v2185_v45 = vpop.eup %2184 }
0x203c   :  { %1547 = vrot.lane.b32.xlu1 %v2185_v45, %s2318_s2  ;;  %v2187_v24 = vpop.eup %2186  ;;  %v1733_v45 = vld [vmem:[%s2838_s7 + $0x30] sm:$0xff] }
0x203d   :  { %v1525_v47 = vadd.f32 1.0, %v2187_v24 }
0x203f   :  { %2188 = vrcp.f32 %v1525_v47  ;;  %v1969_v47 = vpack.c.bf16 %v1734_v46, %v1733_v45 }
0x2049   :  { %v2189_v48 = vpop.eup %2188 }
0x20ae   :  { %v1548_v50 = vpop.permute.xlu1 %1547 }
0x20af   :  { %v1550_v37 = vmul.f32 %v2189_v48, %v1548_v50  ;;  %v2321_v50 = vmov 0.0  }
0x20b1   :  { %v1551_v59 = vpack.c.bf16 %v1550_v37, %v1550_v37 }
0x20b3   :  { %v1553_v51 = vrot.slane %v1551_v59, 1 }
0x20b5   :  { %1923 = vmatmul.mubr.msk.bf16.vlgmr.msra.gmra.mrb[32].mxu0 %vm201_vm1, %v1553_v51 }
0x20b6   :  { %1956 = vmatprep.mubr.msk.f32.mxu0 %vm2320_vm5, %v2321_v50 }
0x2188   :  { %v1591_v52 = vpop.f32.mrb[32].mxu0 }
0x2189   :  { %v1593_v53 = vpop.f32.mrb[33].mxu0  ;;  %v1600_v58 = vrot.slane %v1591_v52, 4 }
0x218a   :  { %v1601_v16 = vrot.slane %v1593_v53, 4  ;;  %v1595_v54 = vpop.f32.mrb[34].mxu0 }
0x218b   :  { %v1596_v55 = vpop.f32.mrb[35].mxu0  ;;  %v1604_v60 = vadd.f32 %v1600_v58, %v2695_v61 }
0x218c   :  { %v1605_v56 = vadd.f32 %v1601_v16, %v2698_v5 }
0x218d   :  { %v1924_v49 = vmul.f32 -1.442695, %v1604_v60 }
0x218e   :  { %2190 = vtanh.f32 %v1605_v56  ;;  %v1925_v62 = vmul.f32 -1.442695, %v1605_v56  ;;  %v1929_v56 = vld [vmem:[%s2839_s8] ss:$0 sm:$0xff]  ;;  %s2322_s8 = smov [#allocation8]  }
0x218f   :  { %2192 = vpow2.f32 %v1924_v49  ;;  %s1844_s14 = sshll.u32 %s2322_s8, 4  ;;  %s1845_s14 = int_to_ptr.vmem [resolvable:$true] %s1844_s14 }
0x2190   :  { %s2284_s15 = scalar_lea.vmem %s1845_s14, 32  ;;  %p2289_p11 = scmp.lt.s32.totalorder %s1845_s14, %s1845_s14 }
0x2191   :  { %p2285_p10 = scmp.ne.s32.totalorder %s1845_s14, %s2284_s15  ;;  %p2290_p12 = scmp.lt.s32.totalorder %s2284_s15, %s2284_s15 }
0x2193   :  { %p2291_p13 = por %p2290_p12, %p2289_p11 }
0x2195   :  { %p2292_p0 = pnand %p2291_p13, %p2285_p10 }
0x2198   :  { %v2191_v57 = vpop.eup %2190 }
0x2199   :  { %1624 = vrot.lane.b32.xlu0 %v2191_v57, %s2318_s2  ;;  %v2193_v63 = vpop.eup %2192 }
0x219a   :  { %v1612_v6 = vadd.f32 1.0, %v2193_v63 }
0x219c   :  { %2194 = vrcp.f32 %v1612_v6 }
0x21a6   :  { %v2195_v13 = vpop.eup %2194 }
0x21a7   :  { %v1622_v15 = vmul.f32 %v2195_v13, %v1620_v12 }
0x220b   :  { %v1625_v14 = vpop.permute.xlu0 %1624 }
0x220c   :  { %v1627_v8 = vmul.f32 %v2195_v13, %v1625_v14 }
0x220e   :  { %1629 = vrot.lane.b32.xlu1 %v1627_v8, %s2318_s2 }
0x2280   :  { %v1630_v2 = vpop.permute.xlu1 %1629 }
0x2281   :  { %v1632_v17 = vadd.f32 %v1630_v2, %v1622_v15 }
0x2283   :  { %2196 = vtanh.f32 %v1632_v17  ;;  %v1708_v43 = vrot.slane %v1632_v17, 6 }
0x2284   :  { %2198 = vpow2.f32 %v1925_v62 }
0x228d   :  { %v2197_v3 = vpop.eup %2196 }
0x228e   :  { %1635 = vrot.lane.b32.xlu0 %v2197_v3, %s2318_s2  ;;  %v2199_v4 = vpop.eup %2198 }
0x228f   :  { %v1613_v7 = vadd.f32 1.0, %v2199_v4 }
0x2291   :  { %2200 = vrcp.f32 %v1613_v7 }
0x229b   :  { %v2201_v9 = vpop.eup %2200 }
0x2300   :  { %v1636_v10 = vpop.permute.xlu0 %1635 }
0x2301   :  { %v1638_v11 = vmul.f32 %v2201_v9, %v1636_v10 }
0x2303   :  { %v1639_v18 = vpack.c.bf16 %v1638_v11, %v1638_v11 }
0x2305   :  { %v1641_v19 = vrot.slane %v1639_v18, 2 }
0x2307   :  { %1926 = vmatmul.mubr.msk.bf16.vlgmr.msra.gmra.mrb[32].mxu1 %vm201_vm1, %v1641_v19 }
0x23da   :  { %v1679_v20 = vpop.f32.mrb[32].mxu1 }
0x23db   :  { %v1681_v1 = vpop.f32.mrb[33].mxu1  ;;  %v1688_v31 = vrot.slane %v1679_v20, 2 }
0x23dc   :  { %v1689_v21 = vrot.slane %v1681_v1, 2  ;;  %v1683_v22 = vpop.f32.mrb[34].mxu1 }
0x23dd   :  { %v1684_v27 = vpop.f32.mrb[35].mxu1  ;;  %v1692_v33 = vadd.f32 %v1688_v31, %v2695_v61  ;;  %v1729_v61 = vld [vmem:[%s2838_s7 + $0x10] sm:$0xff] }
0x23de   :  { %v1693_v29 = vadd.f32 %v1689_v21, %v2698_v5  ;;  %v1727_v5 = vld [vmem:[%s2838_s7] sm:$0xff]  ;;  %v1963_v39 = vpack.c.bf16 %v1730_v38, %v1729_v61 }
0x23df   :  { %v1927_v35 = vmul.f32 -1.442695, %v1692_v33  ;;  %v1960_v34 = vpack.c.bf16 %v1728_v28, %v1727_v5 }
0x23e0   :  { %2202 = vtanh.f32 %v1693_v29  ;;  %v1928_v59 = vmul.f32 -1.442695, %v1693_v29 }
0x23e1   :  { %2204 = vpow2.f32 %v1927_v35  ;;  %1961 = vmatpush3.bf16.msra.mxu0 %v1960_v34 }
0x23e2   :  { %1962 = vmatprep.subr.bf16.mxu0 %v2319_v32 }
0x23e5   :  { %1964 = vmatpush3.bf16.msra.mxu0 %v1963_v39 }
0x23e6   :  { %1965 = vmatprep.subr.bf16.mxu0 %v2319_v32 }
0x23e9   :  { %1967 = vmatpush3.bf16.msra.mxu0 %v1966_v42 }
0x23ea   :  { %v2203_v30 = vpop.eup %2202  ;;  %1968 = vmatprep.subr.bf16.mxu0 %v2319_v32 }
0x23eb   :  { %1712 = vrot.lane.b32.xlu1 %v2203_v30, %s2318_s2  ;;  %v2205_v36 = vpop.eup %2204 }
0x23ec   :  { %v1700_v23 = vadd.f32 1.0, %v2205_v36 }
0x23ed   :  { %1970 = vmatpush3.bf16.msra.mxu0 %v1969_v47 }
0x23ee   :  { %2206 = vrcp.f32 %v1700_v23 }
0x23f8   :  { %v2207_v0 = vpop.eup %2206 }
0x23f9   :  { %v1710_v44 = vmul.f32 %v2207_v0, %v1708_v43 }
0x245d   :  { %v1713_v26 = vpop.permute.xlu1 %1712 }
0x245e   :  { %v1715_v25 = vmul.f32 %v2207_v0, %v1713_v26 }
0x2460   :  { %1717 = vrot.lane.b32.xlu0 %v1715_v25, %s2318_s2 }
0x24d2   :  { %v1718_v24 = vpop.permute.xlu0 %1717 }
0x24d3   :  { %v1720_v48 = vadd.f32 %v1718_v24, %v1710_v44 }
0x24d5   :  { %2208 = vtanh.f32 %v1720_v48 }
0x24d6   :  { %2210 = vpow2.f32 %v1928_v59 }
0x24df   :  { %v2209_v37 = vpop.eup %2208 }
0x24e0   :  { %1723 = vrot.lane.b32.xlu1 %v2209_v37, %s2318_s2  ;;  %v2211_v51 = vpop.eup %2210 }
0x24e1   :  { %v1701_v52 = vadd.f32 1.0, %v2211_v51 }
0x24e3   :  { %2212 = vrcp.f32 %v1701_v52 }
0x24ed   :  { %v2213_v53 = vpop.eup %2212 }
0x2552   :  { %v1724_v16 = vpop.permute.xlu1 %1723 }
0x2553   :  { %v1726_v54 = vmul.f32 %v2213_v53, %v1724_v16 }
0x2555   :  { %v1743_v55 = vrot.slane %v1726_v54, 6 }
0x2557   :  { %1957 = vmatmul.mubr.msk.f32.vlgmr.msra.gmra.mrb[36].mxu0 %vm201_vm1, %v1743_v55 }
0x262a   :  { %v1812_v57 = vpop.f32.mrb[36].mxu0 }
0x262b   :  { %v1813_v58 = vadd.f32 %v1929_v56, %v1812_v57  ;;  %v1958_v60 = vpop.f32.mrb[37].mxu0 }
0x262d   :  { %v1819_v49 = vand.u32 2147483647, %v1813_v58  ;;  %v1816_v62 = vmax.f32 %v1813_v58, 0.0  ;;  %vm1817_vm8 = vcmp.ne.f32.partialorder %v1813_v58, %v1813_v58 }
0x262f   :  { %v1820_v63 = vsub.f32 0.0, %v1819_v49 }
0x2631   :  { %v1821_v6 = vmul.f32 1.442695, %v1820_v63 }
0x2633   :  { %2214 = vpow2.f32 %v1821_v6 }
0x263d   :  { %v2215_v13 = vpop.eup %2214 }
0x263e   :  { %v1823_v14 = vadd.f32 1.0, %v2215_v13  ;;  %v1826_v8 = vmul.f32 -0.5, %v2215_v13  ;;  %v1829_v15 = vand.u32 2147483647, %v2215_v13 }
0x2640   :  { %2216 = vlog2.f32 %v1823_v14  ;;  %v1827_v12 = vadd.f32 1.0, %v1826_v8  ;;  %vm1830_vm6 = vcmp.lt.f32.partialorder %v1829_v15, 0.0004427343 }
0x2642   :  { %v1828_v3 = vmul.f32 %v2215_v13, %v1827_v12 }
0x264a   :  { %v2217_v2 = vpop.eup %2216 }
0x264b   :  { %v1825_v17 = vmul.f32 0.6931472, %v2217_v2 }
0x264d   :  { %v1831_v4 = vsel %vm1830_vm6, %v1828_v3, %v1825_v17 }
0x264e   :  { %v1832_v7 = vadd.f32 %v1831_v4, %v1816_v62 }
0x2650   :  { %v1833_v9 = vsel %vm1817_vm8, %v1813_v58, %v1832_v7 }
0x2651   :  { %v1835_v10 = vsel %vm1834_vm7, %v1813_v58, %v1833_v9 }
0x2652   :  { %1837 = vst.msk [vmem:[#allocation8] sm:$0x3] %vm1836_vm9, %v1835_v10 }
0x2653   :  { %2295 = shalt.err (!%p2292_p0)
}
0x2654   :  { %s2296_s18 = scalar_lea.hbm %s2840_s9, 32 }
0x2655   :  { %p2297_p1 = scmp.ne.s32.totalorder %s2840_s9, %s2296_s18  ;;  %p2300_p2 = scmp.lt.u32.totalorder %s2296_s18, %s2840_s9 }
0x2657   :  { %p2302_p3 = pnand %p2300_p2, %p2297_p1 }
0x2659   :  { %2305 = shalt.err (!%p2302_p3)
}
0x265a   :  { %1847 = dma.vmem_to_hbm [thread:$0]  %s1845_s14, 32, %s2840_s9, [#allocation4]  }
0x265b   :  { %2310 = dma.done.wait [#allocation4], 32  }
0x265c   :  { %2311 = vsyncadd [#allocation4], 4294967264 }
0x265d   :  { %1851 = vsyncpa [#allocation3], 1 }
0x265e   :  { %1852 = vsyncpa [#allocation6], 1 }
0x265f   :  { %1853 = vsyncpa [#allocation4], 1 }

</bundles_post_ra>
